<compile_context>
chip_gen: v7x
topology: tpu7x:2x2x1
jax: 0.10.0
libtpu: 0.0.40
codegen_flags: <defaults>
</compile_context>

<pallas_src>
import math
from functools import partial

import jax
import jax.numpy as jnp
from jax.experimental import pallas as pl
from jax.experimental.pallas import tpu as pltpu

EPS = 1e-5      # torch.nn.LayerNorm default eps
LANE = 128


# ---------------------------------------------------------------------------
# in-kernel helpers (f32 math on the VPU/EUP/XLU)
# ---------------------------------------------------------------------------
def _ln_normalize(x):
    mu = jnp.mean(x, axis=-1, keepdims=True)
    var = jnp.mean((x - mu) ** 2, axis=-1, keepdims=True)
    return (x - mu) * jax.lax.rsqrt(var + EPS)


def _gelu_exact(x):
    # F.gelu default = exact erf-based gelu
    return 0.5 * x * (1.0 + jax.lax.erf(x * (1.0 / math.sqrt(2.0))))


# ---------------------------------------------------------------------------
# fused kernel: grid = (batch, layer); activation resident in VMEM scratch
# ---------------------------------------------------------------------------
def fused_transformer_kernel(
        x_ref, pos_ref,
        qn_g, qn_b, kvn_g, kvn_b,
        qw, kw, vw, pw, pb,
        n1_g, n1_b, w1, b1, w2, b2,
        hn_g, hn_b, pool_w, pool_b, fc_w, fc_b,
        logits_ref, xseq_ref,
        state_ref,
        *, num_heads):
    l = pl.program_id(1)
    n_layers = pl.num_programs(1)

    @pl.when(l == 0)
    def _():  # load activation (+ positional embedding) into the resident state
        state_ref[...] = x_ref[0] + pos_ref[0]

    x = state_ref[...]                               # (N, D) f32, VMEM resident
    N, D = x.shape
    hd = D // num_heads
    scale = 1.0 / math.sqrt(hd)

    # ---- pre-norms: one mean/var pass, two affine pairs --------------------
    xn = _ln_normalize(x)
    qn = (xn * qn_g[0] + qn_b[0]).astype(jnp.bfloat16)     # (N, D) bf16
    kvn = (xn * kvn_g[0] + kvn_b[0]).astype(jnp.bfloat16)  # (N, D) bf16

    # ---- multi-head attention: per-head weight slabs, fused out-projection --
    attn = jnp.zeros((N, D), jnp.float32)
    for h in range(num_heads):
        qh = jnp.dot(qn, qw[0, h], preferred_element_type=jnp.float32)   # (N, hd)
        kh = jnp.dot(kvn, kw[0, h], preferred_element_type=jnp.float32)  # (N, hd)
        vh = jnp.dot(kvn, vw[0, h], preferred_element_type=jnp.float32)  # (N, hd)
        s = jax.lax.dot_general(                                         # q @ k.T
            qh.astype(jnp.bfloat16), kh.astype(jnp.bfloat16),
            dimension_numbers=(((1,), (1,)), ((), ())),
            preferred_element_type=jnp.float32) * scale                  # (N, N)
        s = s - jnp.max(s, axis=-1, keepdims=True)
        e = jnp.exp(s)
        p = e * pl.reciprocal(jnp.sum(e, axis=-1, keepdims=True), approx=True)
        oh = jnp.dot(p.astype(jnp.bfloat16), vh.astype(jnp.bfloat16),
                     preferred_element_type=jnp.float32)                 # (N, hd)
        # fuse output projection: accumulate head_out @ pw[h]
        attn = attn + jnp.dot(oh.astype(jnp.bfloat16), pw[0, h],
                              preferred_element_type=jnp.float32)        # (N, D)
    attn = attn + pb[0]

    # ---- residual + norm1 ---------------------------------------------------
    src = _ln_normalize(x + attn) * n1_g[0] + n1_b[0]

    # ---- feed-forward (exact GELU) ------------------------------------------
    h1 = jnp.dot(src.astype(jnp.bfloat16), w1[0],
                 preferred_element_type=jnp.float32) + b1[0]
    h1 = _gelu_exact(h1)
    src2 = jnp.dot(h1.astype(jnp.bfloat16), w2[0],
                   preferred_element_type=jnp.float32) + b2[0]

    new_x = src + src2
    state_ref[...] = new_x

    # ---- classifier head fused into the last layer step ---------------------
    @pl.when(l == n_layers - 1)
    def _():
        xs = _ln_normalize(new_x) * hn_g[...] + hn_b[...]                # (N, D)
        # attention (sequence) pooling: VPU broadcast-mul + reductions
        scores = jnp.sum(xs * pool_w[...], axis=-1, keepdims=True) + pool_b[...]  # (N,1)
        scores = scores - jnp.max(scores, axis=0, keepdims=True)
        wgt = jnp.exp(scores)
        wgt = wgt * pl.reciprocal(jnp.sum(wgt, axis=0, keepdims=True), approx=True)
        pooled = jnp.sum(wgt * new_x, axis=0, keepdims=True)             # (1, D) pools x (pre-norm)
        logits = jnp.dot(pooled.astype(jnp.bfloat16), fc_w[...],
                         preferred_element_type=jnp.float32) + fc_b[...]  # (1, Cpad)
        xseq_ref[0] = xs
        logits_ref[0] = logits


# ---------------------------------------------------------------------------
# parameter packing: stack per-layer params to (L, ...), cast matmul weights
# to bf16, split weights per head, pad the classifier lane dim to 128.
# ---------------------------------------------------------------------------
def pack_params(params, num_heads, lane=LANE):
    blocks = params["blocks"]
    L = len(blocks)
    D = blocks[0]["qw"].shape[0]
    hd = D // num_heads

    def stack_vec(key):                       # (dim,) -> (L, 1, dim) f32
        return jnp.stack([b[key] for b in blocks])[:, None, :]

    def stack_heads_out(key):                 # (D, D) -> (L, H, D, hd) bf16
        w = jnp.stack([b[key] for b in blocks])
        return w.reshape(L, D, num_heads, hd).transpose(0, 2, 1, 3).astype(jnp.bfloat16)

    pw = jnp.stack([b["pw"] for b in blocks]).reshape(
        L, num_heads, hd, D).astype(jnp.bfloat16)          # (L, H, hd, D)

    packed = {
        "pos_emb": params["pos_emb"].astype(jnp.float32),
        "qn_g": stack_vec("qn_g"), "qn_b": stack_vec("qn_b"),
        "kvn_g": stack_vec("kvn_g"), "kvn_b": stack_vec("kvn_b"),
        "qw": stack_heads_out("qw"), "kw": stack_heads_out("kw"),
        "vw": stack_heads_out("vw"),
        "pw": pw, "pb": stack_vec("pb"),
        "n1_g": stack_vec("n1_g"), "n1_b": stack_vec("n1_b"),
        "w1": jnp.stack([b["w1"] for b in blocks]).astype(jnp.bfloat16),
        "b1": stack_vec("b1"),
        "w2": jnp.stack([b["w2"] for b in blocks]).astype(jnp.bfloat16),
        "b2": stack_vec("b2"),
    }
    hp = params["head"]
    C = hp["fc_w"].shape[1]
    c_pad = max(lane, ((C + lane - 1) // lane) * lane)
    fc_w = jnp.zeros((D, c_pad), jnp.float32).at[:, :C].set(hp["fc_w"]).astype(jnp.bfloat16)
    fc_b = jnp.zeros((1, c_pad), jnp.float32).at[0, :C].set(hp["fc_b"])
    packed.update({
        "hn_g": hp["n_g"][None, :], "hn_b": hp["n_b"][None, :],
        "pool_w": hp["pool_w"][None, :],           # (1, D)
        "pool_b": hp["pool_b"].reshape(1, 1),
        "fc_w": fc_w, "fc_b": fc_b,
        "num_classes": C,
    })
    return packed


_LAYER_KEYS = ["qn_g", "qn_b", "kvn_g", "kvn_b",
               "qw", "kw", "vw", "pw", "pb",
               "n1_g", "n1_b", "w1", "b1", "w2", "b2"]
_HEAD_KEYS = ["hn_g", "hn_b", "pool_w", "pool_b", "fc_w", "fc_b"]


def transformer_classifier_forward(x, packed, num_heads):
    B, N, D = x.shape
    L = packed["qw"].shape[0]
    c_pad = packed["fc_w"].shape[1]
    num_classes = packed["num_classes"]

    def layer_spec(arr):          # weight stacks indexed by the layer grid axis
        rest = arr.shape[1:]
        n = len(rest)
        return pl.BlockSpec((1,) + rest, lambda b, l, _n=n: (l,) + (0,) * _n)

    def const_spec(arr):          # whole array, DMA'd once per batch element
        nd = arr.ndim
        return pl.BlockSpec(arr.shape, lambda b, l, _nd=nd: (0,) * _nd)

    in_specs = ([pl.BlockSpec((1, N, D), lambda b, l: (b, 0, 0)),   # x
                 const_spec(packed["pos_emb"])]
                + [layer_spec(packed[k]) for k in _LAYER_KEYS]
                + [const_spec(packed[k]) for k in _HEAD_KEYS])

    kernel = partial(fused_transformer_kernel, num_heads=num_heads)

    logits_pad, x_seq = pl.pallas_call(
        kernel,
        out_shape=(jax.ShapeDtypeStruct((B, 1, c_pad), jnp.float32),
                   jax.ShapeDtypeStruct((B, N, D), jnp.float32)),
        grid=(B, L),
        in_specs=in_specs,
        out_specs=(pl.BlockSpec((1, 1, c_pad), lambda b, l: (b, 0, 0)),
                   pl.BlockSpec((1, N, D), lambda b, l: (b, 0, 0))),
        scratch_shapes=[pltpu.VMEM((N, D), jnp.float32)],   # activation carry
        compiler_params=pltpu.CompilerParams(
            dimension_semantics=("parallel", "arbitrary"),
            vmem_limit_bytes=32 * 1024 * 1024),
    )(x, packed["pos_emb"],
      *[packed[k] for k in _LAYER_KEYS],
      *[packed[k] for k in _HEAD_KEYS])

    return logits_pad[:, 0, :num_classes], x_seq


# ---------------------------------------------------------------------------
# deterministic parameter init (mirrors module __init__ shapes / init_weight)
# ---------------------------------------------------------------------------
def init_params(key, *, N, D, FF, C, L):
    keys = iter(jax.random.split(key, 64))

    def tn(shape, std=0.02):
        return std * jax.random.truncated_normal(next(keys), -2.0, 2.0, shape, jnp.float32)

    params = {"pos_emb": tn((1, N, D), std=0.2), "blocks": []}
    for _ in range(L):
        params["blocks"].append({
            "qn_g": jnp.ones((D,), jnp.float32), "qn_b": jnp.zeros((D,), jnp.float32),
            "kvn_g": jnp.ones((D,), jnp.float32), "kvn_b": jnp.zeros((D,), jnp.float32),
            "qw": tn((D, D)),                       # Linear(D, D, bias=False), stored (in, out)
            "kw": tn((D, D)), "vw": tn((D, D)),     # kv projection split into k / v
            "pw": tn((D, D)), "pb": jnp.zeros((D,), jnp.float32),
            "n1_g": jnp.ones((D,), jnp.float32), "n1_b": jnp.zeros((D,), jnp.float32),
            "w1": tn((D, FF)), "b1": jnp.zeros((FF,), jnp.float32),
            "w2": tn((FF, D)), "b2": jnp.zeros((D,), jnp.float32),
        })
    params["head"] = {
        "n_g": jnp.ones((D,), jnp.float32), "n_b": jnp.zeros((D,), jnp.float32),
        "pool_w": tn((D,)), "pool_b": jnp.zeros((), jnp.float32),
        "fc_w": tn((D, C)), "fc_b": jnp.zeros((C,), jnp.float32),
    }
    return params


# ---------------------------------------------------------------------------
# pure-JAX f32 reference (same math) for a correctness check
# ---------------------------------------------------------------------------
def ref_forward(x, params, num_heads):
    def ln(t, g, b):
        mu = t.mean(-1, keepdims=True)
        var = ((t - mu) ** 2).mean(-1, keepdims=True)
        return (t - mu) / jnp.sqrt(var + EPS) * g + b

    x = x + params["pos_emb"]
    B, N, D = x.shape
    hd = D // num_heads
    scale = hd ** -0.5
    for p in params["blocks"]:
        qn = ln(x, p["qn_g"], p["qn_b"])
        kvn = ln(x, p["kvn_g"], p["kvn_b"])
        q = qn @ p["qw"]
        k = kvn @ p["kw"]
        v = kvn @ p["vw"]
        qh = q.reshape(B, N, num_heads, hd).transpose(0, 2, 1, 3)
        kh = k.reshape(B, N, num_heads, hd).transpose(0, 2, 1, 3)
        vh = v.reshape(B, N, num_heads, hd).transpose(0, 2, 1, 3)
        att = jax.nn.softmax(jnp.einsum("bhqd,bhkd->bhqk", qh, kh) * scale, axis=-1)
        o = jnp.einsum("bhqk,bhkd->bhqd", att, vh).transpose(0, 2, 1, 3).reshape(B, N, D)
        o = o @ p["pw"] + p["pb"]
        src = ln(x + o, p["n1_g"], p["n1_b"])
        h1 = jax.nn.gelu(src @ p["w1"] + p["b1"], approximate=False)
        x = src + (h1 @ p["w2"] + p["b2"])
    hp = params["head"]
    xs = ln(x, hp["n_g"], hp["n_b"])
    scores = jnp.einsum("bnd,d->bn", xs, hp["pool_w"]) + hp["pool_b"]
    w = jax.nn.softmax(scores, axis=1)                         # softmax over sequence
    pooled = jnp.einsum("bn,bnd->bd", w, x)                    # pools x, not x_seq
    logits = pooled @ hp["fc_w"] + hp["fc_b"]
    return logits, xs


# ---------------------------------------------------------------------------
if __name__ == "__main__":
    B, N, D, H, L = 2, 8, 32, 4, 2
    MLP_RATIO, C = 2.0, 10
    FF = int(D * MLP_RATIO)

    root = jax.random.PRNGKey(0)
    k_param, k_x = jax.random.split(root)
    params = init_params(k_param, N=N, D=D, FF=FF, C=C, L=L)
    x = jax.random.normal(k_x, (B, N, D), dtype=jnp.float32)

    packed = pack_params(params, num_heads=H)
    logits, x_seq = transformer_classifier_forward(x, packed, num_heads=H)
    jax.block_until_ready((logits, x_seq))

    ref_logits, ref_xseq = ref_forward(x, params, num_heads=H)
    assert logits.shape == (B, C) and x_seq.shape == (B, N, D)
    # bf16 MXU operands + approx reciprocal -> relaxed tolerance vs pure-f32 ref
    assert jnp.allclose(logits, ref_logits, atol=5e-2, rtol=5e-2), \
        float(jnp.max(jnp.abs(logits - ref_logits)))
    assert jnp.allclose(x_seq, ref_xseq, atol=5e-2, rtol=5e-2), \
        float(jnp.max(jnp.abs(x_seq - ref_xseq)))

    print("KERNEL_OK")
</pallas_src>

<mosaic_0001>
module attributes {stable_mosaic.version = 11 : i64} {
  func.func @fused_transformer_kernel(%arg0: i32, %arg1: i32, %arg2: memref<1x8x32xf32, #tpu.memory_space<vmem>>, %arg3: memref<1x8x32xf32, #tpu.memory_space<vmem>>, %arg4: memref<1x1x32xf32, #tpu.memory_space<vmem>>, %arg5: memref<1x1x32xf32, #tpu.memory_space<vmem>>, %arg6: memref<1x1x32xf32, #tpu.memory_space<vmem>>, %arg7: memref<1x1x32xf32, #tpu.memory_space<vmem>>, %arg8: memref<1x4x32x8xbf16, #tpu.memory_space<vmem>>, %arg9: memref<1x4x32x8xbf16, #tpu.memory_space<vmem>>, %arg10: memref<1x4x32x8xbf16, #tpu.memory_space<vmem>>, %arg11: memref<1x4x8x32xbf16, #tpu.memory_space<vmem>>, %arg12: memref<1x1x32xf32, #tpu.memory_space<vmem>>, %arg13: memref<1x1x32xf32, #tpu.memory_space<vmem>>, %arg14: memref<1x1x32xf32, #tpu.memory_space<vmem>>, %arg15: memref<1x32x64xbf16, #tpu.memory_space<vmem>>, %arg16: memref<1x1x64xf32, #tpu.memory_space<vmem>>, %arg17: memref<1x64x32xbf16, #tpu.memory_space<vmem>>, %arg18: memref<1x1x32xf32, #tpu.memory_space<vmem>>, %arg19: memref<1x32xf32, #tpu.memory_space<vmem>>, %arg20: memref<1x32xf32, #tpu.memory_space<vmem>>, %arg21: memref<1x32xf32, #tpu.memory_space<vmem>>, %arg22: memref<1x1xf32, #tpu.memory_space<vmem>>, %arg23: memref<32x128xbf16, #tpu.memory_space<vmem>>, %arg24: memref<1x128xf32, #tpu.memory_space<vmem>>, %arg25: memref<1x1x128xf32, #tpu.memory_space<vmem>>, %arg26: memref<1x8x32xf32, #tpu.memory_space<vmem>>, %arg27: memref<8x32xf32, #tpu.memory_space<vmem>>) attributes {dimension_semantics = [#tpu.dimension_semantics<parallel>, #tpu.dimension_semantics<arbitrary>], iteration_bounds = array<i64: 2, 2>, scalar_prefetch = 0 : i64, scratch_operands = 1 : i64, tpu.core_type = #tpu.core_type<tc>, window_params = [{transform_indices = @transform_0, window_bounds = array<i64: 1, 8, 32>}, {pipeline_mode = #tpu.pipeline_mode<synchronous>, transform_indices = @transform_1, window_bounds = array<i64: 1, 8, 32>}, {transform_indices = @transform_2, window_bounds = array<i64: 1, 1, 32>}, {transform_indices = @transform_3, window_bounds = array<i64: 1, 1, 32>}, {transform_indices = @transform_4, window_bounds = array<i64: 1, 1, 32>}, {transform_indices = @transform_5, window_bounds = array<i64: 1, 1, 32>}, {transform_indices = @transform_6, window_bounds = array<i64: 1, 4, 32, 8>}, {transform_indices = @transform_7, window_bounds = array<i64: 1, 4, 32, 8>}, {transform_indices = @transform_8, window_bounds = array<i64: 1, 4, 32, 8>}, {transform_indices = @transform_9, window_bounds = array<i64: 1, 4, 8, 32>}, {transform_indices = @transform_10, window_bounds = array<i64: 1, 1, 32>}, {transform_indices = @transform_11, window_bounds = array<i64: 1, 1, 32>}, {transform_indices = @transform_12, window_bounds = array<i64: 1, 1, 32>}, {transform_indices = @transform_13, window_bounds = array<i64: 1, 32, 64>}, {transform_indices = @transform_14, window_bounds = array<i64: 1, 1, 64>}, {transform_indices = @transform_15, window_bounds = array<i64: 1, 64, 32>}, {transform_indices = @transform_16, window_bounds = array<i64: 1, 1, 32>}, {pipeline_mode = #tpu.pipeline_mode<synchronous>, transform_indices = @transform_17, window_bounds = array<i64: 1, 32>}, {pipeline_mode = #tpu.pipeline_mode<synchronous>, transform_indices = @transform_18, window_bounds = array<i64: 1, 32>}, {pipeline_mode = #tpu.pipeline_mode<synchronous>, transform_indices = @transform_19, window_bounds = array<i64: 1, 32>}, {pipeline_mode = #tpu.pipeline_mode<synchronous>, transform_indices = @transform_20, window_bounds = array<i64: 1, 1>}, {pipeline_mode = #tpu.pipeline_mode<synchronous>, transform_indices = @transform_21, window_bounds = array<i64: 32, 128>}, {pipeline_mode = #tpu.pipeline_mode<synchronous>, transform_indices = @transform_22, window_bounds = array<i64: 1, 128>}, {transform_indices = @transform_23, window_bounds = array<i64: 1, 1, 128>}, {transform_indices = @transform_24, window_bounds = array<i64: 1, 8, 32>}]} {
    %c0_i32 = arith.constant 0 : i32
    %0 = arith.cmpi eq, %arg1, %c0_i32 : i32
    %1 = arith.extui %0 : i1 to i32
    %c0_i32_0 = arith.constant 0 : i32
    %2 = arith.cmpi ne, %1, %c0_i32_0 : i32
    scf.if %2 {
      %c0_150 = arith.constant 0 : index
      %c0_151 = arith.constant 0 : index
      %c0_152 = arith.constant 0 : index
      %229 = vector.load %arg2[%c0_150, %c0_151, %c0_152] : memref<1x8x32xf32, #tpu.memory_space<vmem>>, vector<1x8x32xf32>
      %230 = vector.shape_cast %229 : vector<1x8x32xf32> to vector<8x32xf32>
      %c0_153 = arith.constant 0 : index
      %c0_154 = arith.constant 0 : index
      %c0_155 = arith.constant 0 : index
      %231 = vector.load %arg3[%c0_153, %c0_154, %c0_155] : memref<1x8x32xf32, #tpu.memory_space<vmem>>, vector<1x8x32xf32>
      %232 = vector.shape_cast %231 : vector<1x8x32xf32> to vector<8x32xf32>
      %233 = arith.addf %230, %232 : vector<8x32xf32>
      %c0_156 = arith.constant 0 : index
      %c0_157 = arith.constant 0 : index
      %234 = vector.load %arg27[%c0_156, %c0_157] : memref<8x32xf32, #tpu.memory_space<vmem>>, vector<8x32xf32>
      tpu.vector_store %arg27[%c0_156, %c0_157], %233 {strides = array<i32>} : memref<8x32xf32, #tpu.memory_space<vmem>>, vector<8x32xf32>,
    } else {
    }
    %c0 = arith.constant 0 : index
    %c0_1 = arith.constant 0 : index
    %3 = vector.load %arg27[%c0, %c0_1] : memref<8x32xf32, #tpu.memory_space<vmem>>, vector<8x32xf32>
    %cst = arith.constant dense<0.000000e+00> : vector<8xf32>
    %4 = vector.multi_reduction <add>, %3, %cst [1] : vector<8x32xf32> to vector<8xf32>
    %5 = vector.shape_cast %4 : vector<8xf32> to vector<8x1xf32>
    %cst_2 = arith.constant 3.200000e+01 : f32
    %6 = vector.broadcast %cst_2 : f32 to vector<8x1xf32>
    %7 = arith.divf %5, %6 : vector<8x1xf32>
    %8 = vector.broadcast %7 : vector<8x1xf32> to vector<8x32xf32>
    %9 = arith.subf %3, %8 : vector<8x32xf32>
    %10 = arith.mulf %9, %9 : vector<8x32xf32>
    %cst_3 = arith.constant dense<0.000000e+00> : vector<8xf32>
    %11 = vector.multi_reduction <add>, %10, %cst_3 [1] : vector<8x32xf32> to vector<8xf32>
    %12 = vector.shape_cast %11 : vector<8xf32> to vector<8x1xf32>
    %cst_4 = arith.constant 3.200000e+01 : f32
    %13 = vector.broadcast %cst_4 : f32 to vector<8x1xf32>
    %14 = arith.divf %12, %13 : vector<8x1xf32>
    %15 = vector.broadcast %7 : vector<8x1xf32> to vector<8x32xf32>
    %16 = arith.subf %3, %15 : vector<8x32xf32>
    %cst_5 = arith.constant 9.99999974E-6 : f32
    %17 = vector.broadcast %cst_5 : f32 to vector<8x1xf32>
    %18 = arith.addf %14, %17 : vector<8x1xf32>
    %19 = math.rsqrt %18 : vector<8x1xf32>
    %20 = vector.broadcast %19 : vector<8x1xf32> to vector<8x32xf32>
    %21 = arith.mulf %16, %20 : vector<8x32xf32>
    %c0_6 = arith.constant 0 : index
    %c0_7 = arith.constant 0 : index
    %c0_8 = arith.constant 0 : index
    %22 = vector.load %arg4[%c0_6, %c0_7, %c0_8] : memref<1x1x32xf32, #tpu.memory_space<vmem>>, vector<1x1x32xf32>
    %23 = vector.shape_cast %22 : vector<1x1x32xf32> to vector<1x32xf32>
    %24 = vector.broadcast %23 : vector<1x32xf32> to vector<8x32xf32>
    %25 = arith.mulf %21, %24 : vector<8x32xf32>
    %c0_9 = arith.constant 0 : index
    %c0_10 = arith.constant 0 : index
    %c0_11 = arith.constant 0 : index
    %26 = vector.load %arg5[%c0_9, %c0_10, %c0_11] : memref<1x1x32xf32, #tpu.memory_space<vmem>>, vector<1x1x32xf32>
    %27 = vector.shape_cast %26 : vector<1x1x32xf32> to vector<1x32xf32>
    %28 = vector.broadcast %27 : vector<1x32xf32> to vector<8x32xf32>
    %29 = arith.addf %25, %28 : vector<8x32xf32>
    %30 = arith.truncf %29 : vector<8x32xf32> to vector<8x32xbf16>
    %c0_12 = arith.constant 0 : index
    %c0_13 = arith.constant 0 : index
    %c0_14 = arith.constant 0 : index
    %31 = vector.load %arg6[%c0_12, %c0_13, %c0_14] : memref<1x1x32xf32, #tpu.memory_space<vmem>>, vector<1x1x32xf32>
    %32 = vector.shape_cast %31 : vector<1x1x32xf32> to vector<1x32xf32>
    %33 = vector.broadcast %32 : vector<1x32xf32> to vector<8x32xf32>
    %34 = arith.mulf %21, %33 : vector<8x32xf32>
    %c0_15 = arith.constant 0 : index
    %c0_16 = arith.constant 0 : index
    %c0_17 = arith.constant 0 : index
    %35 = vector.load %arg7[%c0_15, %c0_16, %c0_17] : memref<1x1x32xf32, #tpu.memory_space<vmem>>, vector<1x1x32xf32>
    %36 = vector.shape_cast %35 : vector<1x1x32xf32> to vector<1x32xf32>
    %37 = vector.broadcast %36 : vector<1x32xf32> to vector<8x32xf32>
    %38 = arith.addf %34, %37 : vector<8x32xf32>
    %39 = arith.truncf %38 : vector<8x32xf32> to vector<8x32xbf16>
    %cst_18 = arith.constant 0.000000e+00 : f32
    %40 = vector.broadcast %cst_18 : f32 to vector<8x32xf32>
    %c0_19 = arith.constant 0 : index
    %c0_20 = arith.constant 0 : index
    %c0_21 = arith.constant 0 : index
    %c0_22 = arith.constant 0 : index
    %41 = vector.load %arg8[%c0_19, %c0_20, %c0_21, %c0_22] : memref<1x4x32x8xbf16, #tpu.memory_space<vmem>>, vector<1x1x32x8xbf16>
    %42 = vector.shape_cast %41 : vector<1x1x32x8xbf16> to vector<32x8xbf16>
    %cst_23 = arith.constant dense<0.000000e+00> : vector<8x8xf32>
    %43 = tpu.matmul %30, %42, %cst_23 {dimension_numbers = #tpu.dot_dimension_numbers<[1], [0], [0], [1], [0, 0, 1, 1], [], []>} : vector<8x32xbf16>, vector<32x8xbf16>, vector<8x8xf32> -> vector<8x8xf32>
    %c0_24 = arith.constant 0 : index
    %c0_25 = arith.constant 0 : index
    %c0_26 = arith.constant 0 : index
    %c0_27 = arith.constant 0 : index
    %44 = vector.load %arg9[%c0_24, %c0_25, %c0_26, %c0_27] : memref<1x4x32x8xbf16, #tpu.memory_space<vmem>>, vector<1x1x32x8xbf16>
    %45 = vector.shape_cast %44 : vector<1x1x32x8xbf16> to vector<32x8xbf16>
    %cst_28 = arith.constant dense<0.000000e+00> : vector<8x8xf32>
    %46 = tpu.matmul %39, %45, %cst_28 {dimension_numbers = #tpu.dot_dimension_numbers<[1], [0], [0], [1], [0, 0, 1, 1], [], []>} : vector<8x32xbf16>, vector<32x8xbf16>, vector<8x8xf32> -> vector<8x8xf32>
    %c0_29 = arith.constant 0 : index
    %c0_30 = arith.constant 0 : index
    %c0_31 = arith.constant 0 : index
    %c0_32 = arith.constant 0 : index
    %47 = vector.load %arg10[%c0_29, %c0_30, %c0_31, %c0_32] : memref<1x4x32x8xbf16, #tpu.memory_space<vmem>>, vector<1x1x32x8xbf16>
    %48 = vector.shape_cast %47 : vector<1x1x32x8xbf16> to vector<32x8xbf16>
    %cst_33 = arith.constant dense<0.000000e+00> : vector<8x8xf32>
    %49 = tpu.matmul %39, %48, %cst_33 {dimension_numbers = #tpu.dot_dimension_numbers<[1], [0], [0], [1], [0, 0, 1, 1], [], []>} : vector<8x32xbf16>, vector<32x8xbf16>, vector<8x8xf32> -> vector<8x8xf32>
    %50 = arith.truncf %43 : vector<8x8xf32> to vector<8x8xbf16>
    %51 = arith.truncf %46 : vector<8x8xf32> to vector<8x8xbf16>
    %cst_34 = arith.constant dense<0.000000e+00> : vector<8x8xf32>
    %52 = tpu.matmul %50, %51, %cst_34 {dimension_numbers = #tpu.dot_dimension_numbers<[1], [1], [0], [0], [0, 0, 1, 0], [], []>} : vector<8x8xbf16>, vector<8x8xbf16>, vector<8x8xf32> -> vector<8x8xf32>
    %cst_35 = arith.constant 0.353553385 : f32
    %53 = vector.broadcast %cst_35 : f32 to vector<8x8xf32>
    %54 = arith.mulf %52, %53 : vector<8x8xf32>
    %cst_36 = arith.constant dense<0xFF800000> : vector<8xf32>
    %55 = vector.multi_reduction <maximumf>, %54, %cst_36 [1] : vector<8x8xf32> to vector<8xf32>
    %56 = vector.shape_cast %55 : vector<8xf32> to vector<8x1xf32>
    %57 = vector.broadcast %56 : vector<8x1xf32> to vector<8x8xf32>
    %58 = arith.subf %54, %57 : vector<8x8xf32>
    %59 = math.exp %58 : vector<8x8xf32>
    %cst_37 = arith.constant dense<0.000000e+00> : vector<8xf32>
    %60 = vector.multi_reduction <add>, %59, %cst_37 [1] : vector<8x8xf32> to vector<8xf32>
    %61 = vector.shape_cast %60 : vector<8xf32> to vector<8x1xf32>
    %62 = tpu.reciprocal %61 {approx = true} : vector<8x1xf32> -> vector<8x1xf32>
    %63 = vector.broadcast %62 : vector<8x1xf32> to vector<8x8xf32>
    %64 = arith.mulf %59, %63 : vector<8x8xf32>
    %65 = arith.truncf %64 : vector<8x8xf32> to vector<8x8xbf16>
    %66 = arith.truncf %49 : vector<8x8xf32> to vector<8x8xbf16>
    %cst_38 = arith.constant dense<0.000000e+00> : vector<8x8xf32>
    %67 = tpu.matmul %65, %66, %cst_38 {dimension_numbers = #tpu.dot_dimension_numbers<[1], [0], [0], [1], [0, 0, 1, 1], [], []>} : vector<8x8xbf16>, vector<8x8xbf16>, vector<8x8xf32> -> vector<8x8xf32>
    %68 = arith.truncf %67 : vector<8x8xf32> to vector<8x8xbf16>
    %c0_39 = arith.constant 0 : index
    %c0_40 = arith.constant 0 : index
    %c0_41 = arith.constant 0 : index
    %c0_42 = arith.constant 0 : index
    %69 = vector.load %arg11[%c0_39, %c0_40, %c0_41, %c0_42] : memref<1x4x8x32xbf16, #tpu.memory_space<vmem>>, vector<1x1x8x32xbf16>
    %70 = vector.shape_cast %69 : vector<1x1x8x32xbf16> to vector<8x32xbf16>
    %cst_43 = arith.constant dense<0.000000e+00> : vector<8x32xf32>
    %71 = tpu.matmul %68, %70, %cst_43 {dimension_numbers = #tpu.dot_dimension_numbers<[1], [0], [0], [1], [0, 0, 1, 1], [], []>} : vector<8x8xbf16>, vector<8x32xbf16>, vector<8x32xf32> -> vector<8x32xf32>
    %72 = arith.addf %40, %71 : vector<8x32xf32>
    %c0_44 = arith.constant 0 : index
    %c1 = arith.constant 1 : index
    %c0_45 = arith.constant 0 : index
    %c0_46 = arith.constant 0 : index
    %73 = vector.load %arg8[%c0_44, %c1, %c0_45, %c0_46] : memref<1x4x32x8xbf16, #tpu.memory_space<vmem>>, vector<1x1x32x8xbf16>
    %74 = vector.shape_cast %73 : vector<1x1x32x8xbf16> to vector<32x8xbf16>
    %cst_47 = arith.constant dense<0.000000e+00> : vector<8x8xf32>
    %75 = tpu.matmul %30, %74, %cst_47 {dimension_numbers = #tpu.dot_dimension_numbers<[1], [0], [0], [1], [0, 0, 1, 1], [], []>} : vector<8x32xbf16>, vector<32x8xbf16>, vector<8x8xf32> -> vector<8x8xf32>
    %c0_48 = arith.constant 0 : index
    %c1_49 = arith.constant 1 : index
    %c0_50 = arith.constant 0 : index
    %c0_51 = arith.constant 0 : index
    %76 = vector.load %arg9[%c0_48, %c1_49, %c0_50, %c0_51] : memref<1x4x32x8xbf16, #tpu.memory_space<vmem>>, vector<1x1x32x8xbf16>
    %77 = vector.shape_cast %76 : vector<1x1x32x8xbf16> to vector<32x8xbf16>
    %cst_52 = arith.constant dense<0.000000e+00> : vector<8x8xf32>
    %78 = tpu.matmul %39, %77, %cst_52 {dimension_numbers = #tpu.dot_dimension_numbers<[1], [0], [0], [1], [0, 0, 1, 1], [], []>} : vector<8x32xbf16>, vector<32x8xbf16>, vector<8x8xf32> -> vector<8x8xf32>
    %c0_53 = arith.constant 0 : index
    %c1_54 = arith.constant 1 : index
    %c0_55 = arith.constant 0 : index
    %c0_56 = arith.constant 0 : index
    %79 = vector.load %arg10[%c0_53, %c1_54, %c0_55, %c0_56] : memref<1x4x32x8xbf16, #tpu.memory_space<vmem>>, vector<1x1x32x8xbf16>
    %80 = vector.shape_cast %79 : vector<1x1x32x8xbf16> to vector<32x8xbf16>
    %cst_57 = arith.constant dense<0.000000e+00> : vector<8x8xf32>
    %81 = tpu.matmul %39, %80, %cst_57 {dimension_numbers = #tpu.dot_dimension_numbers<[1], [0], [0], [1], [0, 0, 1, 1], [], []>} : vector<8x32xbf16>, vector<32x8xbf16>, vector<8x8xf32> -> vector<8x8xf32>
    %82 = arith.truncf %75 : vector<8x8xf32> to vector<8x8xbf16>
    %83 = arith.truncf %78 : vector<8x8xf32> to vector<8x8xbf16>
    %cst_58 = arith.constant dense<0.000000e+00> : vector<8x8xf32>
    %84 = tpu.matmul %82, %83, %cst_58 {dimension_numbers = #tpu.dot_dimension_numbers<[1], [1], [0], [0], [0, 0, 1, 0], [], []>} : vector<8x8xbf16>, vector<8x8xbf16>, vector<8x8xf32> -> vector<8x8xf32>
    %cst_59 = arith.constant 0.353553385 : f32
    %85 = vector.broadcast %cst_59 : f32 to vector<8x8xf32>
    %86 = arith.mulf %84, %85 : vector<8x8xf32>
    %cst_60 = arith.constant dense<0xFF800000> : vector<8xf32>
    %87 = vector.multi_reduction <maximumf>, %86, %cst_60 [1] : vector<8x8xf32> to vector<8xf32>
    %88 = vector.shape_cast %87 : vector<8xf32> to vector<8x1xf32>
    %89 = vector.broadcast %88 : vector<8x1xf32> to vector<8x8xf32>
    %90 = arith.subf %86, %89 : vector<8x8xf32>
    %91 = math.exp %90 : vector<8x8xf32>
    %cst_61 = arith.constant dense<0.000000e+00> : vector<8xf32>
    %92 = vector.multi_reduction <add>, %91, %cst_61 [1] : vector<8x8xf32> to vector<8xf32>
    %93 = vector.shape_cast %92 : vector<8xf32> to vector<8x1xf32>
    %94 = tpu.reciprocal %93 {approx = true} : vector<8x1xf32> -> vector<8x1xf32>
    %95 = vector.broadcast %94 : vector<8x1xf32> to vector<8x8xf32>
    %96 = arith.mulf %91, %95 : vector<8x8xf32>
    %97 = arith.truncf %96 : vector<8x8xf32> to vector<8x8xbf16>
    %98 = arith.truncf %81 : vector<8x8xf32> to vector<8x8xbf16>
    %cst_62 = arith.constant dense<0.000000e+00> : vector<8x8xf32>
    %99 = tpu.matmul %97, %98, %cst_62 {dimension_numbers = #tpu.dot_dimension_numbers<[1], [0], [0], [1], [0, 0, 1, 1], [], []>} : vector<8x8xbf16>, vector<8x8xbf16>, vector<8x8xf32> -> vector<8x8xf32>
    %100 = arith.truncf %99 : vector<8x8xf32> to vector<8x8xbf16>
    %c0_63 = arith.constant 0 : index
    %c1_64 = arith.constant 1 : index
    %c0_65 = arith.constant 0 : index
    %c0_66 = arith.constant 0 : index
    %101 = vector.load %arg11[%c0_63, %c1_64, %c0_65, %c0_66] : memref<1x4x8x32xbf16, #tpu.memory_space<vmem>>, vector<1x1x8x32xbf16>
    %102 = vector.shape_cast %101 : vector<1x1x8x32xbf16> to vector<8x32xbf16>
    %cst_67 = arith.constant dense<0.000000e+00> : vector<8x32xf32>
    %103 = tpu.matmul %100, %102, %cst_67 {dimension_numbers = #tpu.dot_dimension_numbers<[1], [0], [0], [1], [0, 0, 1, 1], [], []>} : vector<8x8xbf16>, vector<8x32xbf16>, vector<8x32xf32> -> vector<8x32xf32>
    %104 = arith.addf %72, %103 : vector<8x32xf32>
    %c0_68 = arith.constant 0 : index
    %c2 = arith.constant 2 : index
    %c0_69 = arith.constant 0 : index
    %c0_70 = arith.constant 0 : index
    %105 = vector.load %arg8[%c0_68, %c2, %c0_69, %c0_70] : memref<1x4x32x8xbf16, #tpu.memory_space<vmem>>, vector<1x1x32x8xbf16>
    %106 = vector.shape_cast %105 : vector<1x1x32x8xbf16> to vector<32x8xbf16>
    %cst_71 = arith.constant dense<0.000000e+00> : vector<8x8xf32>
    %107 = tpu.matmul %30, %106, %cst_71 {dimension_numbers = #tpu.dot_dimension_numbers<[1], [0], [0], [1], [0, 0, 1, 1], [], []>} : vector<8x32xbf16>, vector<32x8xbf16>, vector<8x8xf32> -> vector<8x8xf32>
    %c0_72 = arith.constant 0 : index
    %c2_73 = arith.constant 2 : index
    %c0_74 = arith.constant 0 : index
    %c0_75 = arith.constant 0 : index
    %108 = vector.load %arg9[%c0_72, %c2_73, %c0_74, %c0_75] : memref<1x4x32x8xbf16, #tpu.memory_space<vmem>>, vector<1x1x32x8xbf16>
    %109 = vector.shape_cast %108 : vector<1x1x32x8xbf16> to vector<32x8xbf16>
    %cst_76 = arith.constant dense<0.000000e+00> : vector<8x8xf32>
    %110 = tpu.matmul %39, %109, %cst_76 {dimension_numbers = #tpu.dot_dimension_numbers<[1], [0], [0], [1], [0, 0, 1, 1], [], []>} : vector<8x32xbf16>, vector<32x8xbf16>, vector<8x8xf32> -> vector<8x8xf32>
    %c0_77 = arith.constant 0 : index
    %c2_78 = arith.constant 2 : index
    %c0_79 = arith.constant 0 : index
    %c0_80 = arith.constant 0 : index
    %111 = vector.load %arg10[%c0_77, %c2_78, %c0_79, %c0_80] : memref<1x4x32x8xbf16, #tpu.memory_space<vmem>>, vector<1x1x32x8xbf16>
    %112 = vector.shape_cast %111 : vector<1x1x32x8xbf16> to vector<32x8xbf16>
    %cst_81 = arith.constant dense<0.000000e+00> : vector<8x8xf32>
    %113 = tpu.matmul %39, %112, %cst_81 {dimension_numbers = #tpu.dot_dimension_numbers<[1], [0], [0], [1], [0, 0, 1, 1], [], []>} : vector<8x32xbf16>, vector<32x8xbf16>, vector<8x8xf32> -> vector<8x8xf32>
    %114 = arith.truncf %107 : vector<8x8xf32> to vector<8x8xbf16>
    %115 = arith.truncf %110 : vector<8x8xf32> to vector<8x8xbf16>
    %cst_82 = arith.constant dense<0.000000e+00> : vector<8x8xf32>
    %116 = tpu.matmul %114, %115, %cst_82 {dimension_numbers = #tpu.dot_dimension_numbers<[1], [1], [0], [0], [0, 0, 1, 0], [], []>} : vector<8x8xbf16>, vector<8x8xbf16>, vector<8x8xf32> -> vector<8x8xf32>
    %cst_83 = arith.constant 0.353553385 : f32
    %117 = vector.broadcast %cst_83 : f32 to vector<8x8xf32>
    %118 = arith.mulf %116, %117 : vector<8x8xf32>
    %cst_84 = arith.constant dense<0xFF800000> : vector<8xf32>
    %119 = vector.multi_reduction <maximumf>, %118, %cst_84 [1] : vector<8x8xf32> to vector<8xf32>
    %120 = vector.shape_cast %119 : vector<8xf32> to vector<8x1xf32>
    %121 = vector.broadcast %120 : vector<8x1xf32> to vector<8x8xf32>
    %122 = arith.subf %118, %121 : vector<8x8xf32>
    %123 = math.exp %122 : vector<8x8xf32>
    %cst_85 = arith.constant dense<0.000000e+00> : vector<8xf32>
    %124 = vector.multi_reduction <add>, %123, %cst_85 [1] : vector<8x8xf32> to vector<8xf32>
    %125 = vector.shape_cast %124 : vector<8xf32> to vector<8x1xf32>
    %126 = tpu.reciprocal %125 {approx = true} : vector<8x1xf32> -> vector<8x1xf32>
    %127 = vector.broadcast %126 : vector<8x1xf32> to vector<8x8xf32>
    %128 = arith.mulf %123, %127 : vector<8x8xf32>
    %129 = arith.truncf %128 : vector<8x8xf32> to vector<8x8xbf16>
    %130 = arith.truncf %113 : vector<8x8xf32> to vector<8x8xbf16>
    %cst_86 = arith.constant dense<0.000000e+00> : vector<8x8xf32>
    %131 = tpu.matmul %129, %130, %cst_86 {dimension_numbers = #tpu.dot_dimension_numbers<[1], [0], [0], [1], [0, 0, 1, 1], [], []>} : vector<8x8xbf16>, vector<8x8xbf16>, vector<8x8xf32> -> vector<8x8xf32>
    %132 = arith.truncf %131 : vector<8x8xf32> to vector<8x8xbf16>
    %c0_87 = arith.constant 0 : index
    %c2_88 = arith.constant 2 : index
    %c0_89 = arith.constant 0 : index
    %c0_90 = arith.constant 0 : index
    %133 = vector.load %arg11[%c0_87, %c2_88, %c0_89, %c0_90] : memref<1x4x8x32xbf16, #tpu.memory_space<vmem>>, vector<1x1x8x32xbf16>
    %134 = vector.shape_cast %133 : vector<1x1x8x32xbf16> to vector<8x32xbf16>
    %cst_91 = arith.constant dense<0.000000e+00> : vector<8x32xf32>
    %135 = tpu.matmul %132, %134, %cst_91 {dimension_numbers = #tpu.dot_dimension_numbers<[1], [0], [0], [1], [0, 0, 1, 1], [], []>} : vector<8x8xbf16>, vector<8x32xbf16>, vector<8x32xf32> -> vector<8x32xf32>
    %136 = arith.addf %104, %135 : vector<8x32xf32>
    %c0_92 = arith.constant 0 : index
    %c3 = arith.constant 3 : index
    %c0_93 = arith.constant 0 : index
    %c0_94 = arith.constant 0 : index
    %137 = vector.load %arg8[%c0_92, %c3, %c0_93, %c0_94] : memref<1x4x32x8xbf16, #tpu.memory_space<vmem>>, vector<1x1x32x8xbf16>
    %138 = vector.shape_cast %137 : vector<1x1x32x8xbf16> to vector<32x8xbf16>
    %cst_95 = arith.constant dense<0.000000e+00> : vector<8x8xf32>
    %139 = tpu.matmul %30, %138, %cst_95 {dimension_numbers = #tpu.dot_dimension_numbers<[1], [0], [0], [1], [0, 0, 1, 1], [], []>} : vector<8x32xbf16>, vector<32x8xbf16>, vector<8x8xf32> -> vector<8x8xf32>
    %c0_96 = arith.constant 0 : index
    %c3_97 = arith.constant 3 : index
    %c0_98 = arith.constant 0 : index
    %c0_99 = arith.constant 0 : index
    %140 = vector.load %arg9[%c0_96, %c3_97, %c0_98, %c0_99] : memref<1x4x32x8xbf16, #tpu.memory_space<vmem>>, vector<1x1x32x8xbf16>
    %141 = vector.shape_cast %140 : vector<1x1x32x8xbf16> to vector<32x8xbf16>
    %cst_100 = arith.constant dense<0.000000e+00> : vector<8x8xf32>
    %142 = tpu.matmul %39, %141, %cst_100 {dimension_numbers = #tpu.dot_dimension_numbers<[1], [0], [0], [1], [0, 0, 1, 1], [], []>} : vector<8x32xbf16>, vector<32x8xbf16>, vector<8x8xf32> -> vector<8x8xf32>
    %c0_101 = arith.constant 0 : index
    %c3_102 = arith.constant 3 : index
    %c0_103 = arith.constant 0 : index
    %c0_104 = arith.constant 0 : index
    %143 = vector.load %arg10[%c0_101, %c3_102, %c0_103, %c0_104] : memref<1x4x32x8xbf16, #tpu.memory_space<vmem>>, vector<1x1x32x8xbf16>
    %144 = vector.shape_cast %143 : vector<1x1x32x8xbf16> to vector<32x8xbf16>
    %cst_105 = arith.constant dense<0.000000e+00> : vector<8x8xf32>
    %145 = tpu.matmul %39, %144, %cst_105 {dimension_numbers = #tpu.dot_dimension_numbers<[1], [0], [0], [1], [0, 0, 1, 1], [], []>} : vector<8x32xbf16>, vector<32x8xbf16>, vector<8x8xf32> -> vector<8x8xf32>
    %146 = arith.truncf %139 : vector<8x8xf32> to vector<8x8xbf16>
    %147 = arith.truncf %142 : vector<8x8xf32> to vector<8x8xbf16>
    %cst_106 = arith.constant dense<0.000000e+00> : vector<8x8xf32>
    %148 = tpu.matmul %146, %147, %cst_106 {dimension_numbers = #tpu.dot_dimension_numbers<[1], [1], [0], [0], [0, 0, 1, 0], [], []>} : vector<8x8xbf16>, vector<8x8xbf16>, vector<8x8xf32> -> vector<8x8xf32>
    %cst_107 = arith.constant 0.353553385 : f32
    %149 = vector.broadcast %cst_107 : f32 to vector<8x8xf32>
    %150 = arith.mulf %148, %149 : vector<8x8xf32>
    %cst_108 = arith.constant dense<0xFF800000> : vector<8xf32>
    %151 = vector.multi_reduction <maximumf>, %150, %cst_108 [1] : vector<8x8xf32> to vector<8xf32>
    %152 = vector.shape_cast %151 : vector<8xf32> to vector<8x1xf32>
    %153 = vector.broadcast %152 : vector<8x1xf32> to vector<8x8xf32>
    %154 = arith.subf %150, %153 : vector<8x8xf32>
    %155 = math.exp %154 : vector<8x8xf32>
    %cst_109 = arith.constant dense<0.000000e+00> : vector<8xf32>
    %156 = vector.multi_reduction <add>, %155, %cst_109 [1] : vector<8x8xf32> to vector<8xf32>
    %157 = vector.shape_cast %156 : vector<8xf32> to vector<8x1xf32>
    %158 = tpu.reciprocal %157 {approx = true} : vector<8x1xf32> -> vector<8x1xf32>
    %159 = vector.broadcast %158 : vector<8x1xf32> to vector<8x8xf32>
    %160 = arith.mulf %155, %159 : vector<8x8xf32>
    %161 = arith.truncf %160 : vector<8x8xf32> to vector<8x8xbf16>
    %162 = arith.truncf %145 : vector<8x8xf32> to vector<8x8xbf16>
    %cst_110 = arith.constant dense<0.000000e+00> : vector<8x8xf32>
    %163 = tpu.matmul %161, %162, %cst_110 {dimension_numbers = #tpu.dot_dimension_numbers<[1], [0], [0], [1], [0, 0, 1, 1], [], []>} : vector<8x8xbf16>, vector<8x8xbf16>, vector<8x8xf32> -> vector<8x8xf32>
    %164 = arith.truncf %163 : vector<8x8xf32> to vector<8x8xbf16>
    %c0_111 = arith.constant 0 : index
    %c3_112 = arith.constant 3 : index
    %c0_113 = arith.constant 0 : index
    %c0_114 = arith.constant 0 : index
    %165 = vector.load %arg11[%c0_111, %c3_112, %c0_113, %c0_114] : memref<1x4x8x32xbf16, #tpu.memory_space<vmem>>, vector<1x1x8x32xbf16>
    %166 = vector.shape_cast %165 : vector<1x1x8x32xbf16> to vector<8x32xbf16>
    %cst_115 = arith.constant dense<0.000000e+00> : vector<8x32xf32>
    %167 = tpu.matmul %164, %166, %cst_115 {dimension_numbers = #tpu.dot_dimension_numbers<[1], [0], [0], [1], [0, 0, 1, 1], [], []>} : vector<8x8xbf16>, vector<8x32xbf16>, vector<8x32xf32> -> vector<8x32xf32>
    %168 = arith.addf %136, %167 : vector<8x32xf32>
    %c0_116 = arith.constant 0 : index
    %c0_117 = arith.constant 0 : index
    %c0_118 = arith.constant 0 : index
    %169 = vector.load %arg12[%c0_116, %c0_117, %c0_118] : memref<1x1x32xf32, #tpu.memory_space<vmem>>, vector<1x1x32xf32>
    %170 = vector.shape_cast %169 : vector<1x1x32xf32> to vector<1x32xf32>
    %171 = vector.broadcast %170 : vector<1x32xf32> to vector<8x32xf32>
    %172 = arith.addf %168, %171 : vector<8x32xf32>
    %173 = arith.addf %3, %172 : vector<8x32xf32>
    %cst_119 = arith.constant dense<0.000000e+00> : vector<8xf32>
    %174 = vector.multi_reduction <add>, %173, %cst_119 [1] : vector<8x32xf32> to vector<8xf32>
    %175 = vector.shape_cast %174 : vector<8xf32> to vector<8x1xf32>
    %cst_120 = arith.constant 3.200000e+01 : f32
    %176 = vector.broadcast %cst_120 : f32 to vector<8x1xf32>
    %177 = arith.divf %175, %176 : vector<8x1xf32>
    %178 = vector.broadcast %177 : vector<8x1xf32> to vector<8x32xf32>
    %179 = arith.subf %173, %178 : vector<8x32xf32>
    %180 = arith.mulf %179, %179 : vector<8x32xf32>
    %cst_121 = arith.constant dense<0.000000e+00> : vector<8xf32>
    %181 = vector.multi_reduction <add>, %180, %cst_121 [1] : vector<8x32xf32> to vector<8xf32>
    %182 = vector.shape_cast %181 : vector<8xf32> to vector<8x1xf32>
    %cst_122 = arith.constant 3.200000e+01 : f32
    %183 = vector.broadcast %cst_122 : f32 to vector<8x1xf32>
    %184 = arith.divf %182, %183 : vector<8x1xf32>
    %185 = vector.broadcast %177 : vector<8x1xf32> to vector<8x32xf32>
    %186 = arith.subf %173, %185 : vector<8x32xf32>
    %cst_123 = arith.constant 9.99999974E-6 : f32
    %187 = vector.broadcast %cst_123 : f32 to vector<8x1xf32>
    %188 = arith.addf %184, %187 : vector<8x1xf32>
    %189 = math.rsqrt %188 : vector<8x1xf32>
    %190 = vector.broadcast %189 : vector<8x1xf32> to vector<8x32xf32>
    %191 = arith.mulf %186, %190 : vector<8x32xf32>
    %c0_124 = arith.constant 0 : index
    %c0_125 = arith.constant 0 : index
    %c0_126 = arith.constant 0 : index
    %192 = vector.load %arg13[%c0_124, %c0_125, %c0_126] : memref<1x1x32xf32, #tpu.memory_space<vmem>>, vector<1x1x32xf32>
    %193 = vector.shape_cast %192 : vector<1x1x32xf32> to vector<1x32xf32>
    %194 = vector.broadcast %193 : vector<1x32xf32> to vector<8x32xf32>
    %195 = arith.mulf %191, %194 : vector<8x32xf32>
    %c0_127 = arith.constant 0 : index
    %c0_128 = arith.constant 0 : index
    %c0_129 = arith.constant 0 : index
    %196 = vector.load %arg14[%c0_127, %c0_128, %c0_129] : memref<1x1x32xf32, #tpu.memory_space<vmem>>, vector<1x1x32xf32>
    %197 = vector.shape_cast %196 : vector<1x1x32xf32> to vector<1x32xf32>
    %198 = vector.broadcast %197 : vector<1x32xf32> to vector<8x32xf32>
    %199 = arith.addf %195, %198 : vector<8x32xf32>
    %200 = arith.truncf %199 : vector<8x32xf32> to vector<8x32xbf16>
    %c0_130 = arith.constant 0 : index
    %c0_131 = arith.constant 0 : index
    %c0_132 = arith.constant 0 : index
    %201 = vector.load %arg15[%c0_130, %c0_131, %c0_132] : memref<1x32x64xbf16, #tpu.memory_space<vmem>>, vector<1x32x64xbf16>
    %202 = vector.shape_cast %201 : vector<1x32x64xbf16> to vector<32x64xbf16>
    %cst_133 = arith.constant dense<0.000000e+00> : vector<8x64xf32>
    %203 = tpu.matmul %200, %202, %cst_133 {dimension_numbers = #tpu.dot_dimension_numbers<[1], [0], [0], [1], [0, 0, 1, 1], [], []>} : vector<8x32xbf16>, vector<32x64xbf16>, vector<8x64xf32> -> vector<8x64xf32>
    %c0_134 = arith.constant 0 : index
    %c0_135 = arith.constant 0 : index
    %c0_136 = arith.constant 0 : index
    %204 = vector.load %arg16[%c0_134, %c0_135, %c0_136] : memref<1x1x64xf32, #tpu.memory_space<vmem>>, vector<1x1x64xf32>
    %205 = vector.shape_cast %204 : vector<1x1x64xf32> to vector<1x64xf32>
    %206 = vector.broadcast %205 : vector<1x64xf32> to vector<8x64xf32>
    %207 = arith.addf %203, %206 : vector<8x64xf32>
    %cst_137 = arith.constant 5.000000e-01 : f32
    %208 = vector.broadcast %cst_137 : f32 to vector<8x64xf32>
    %209 = arith.mulf %208, %207 : vector<8x64xf32>
    %cst_138 = arith.constant 0.707106769 : f32
    %210 = vector.broadcast %cst_138 : f32 to vector<8x64xf32>
    %211 = arith.mulf %207, %210 : vector<8x64xf32>
    %212 = math.erf %211 : vector<8x64xf32>
    %cst_139 = arith.constant 1.000000e+00 : f32
    %213 = vector.broadcast %cst_139 : f32 to vector<8x64xf32>
    %214 = arith.addf %213, %212 : vector<8x64xf32>
    %215 = arith.mulf %209, %214 : vector<8x64xf32>
    %216 = arith.truncf %215 : vector<8x64xf32> to vector<8x64xbf16>
    %c0_140 = arith.constant 0 : index
    %c0_141 = arith.constant 0 : index
    %c0_142 = arith.constant 0 : index
    %217 = vector.load %arg17[%c0_140, %c0_141, %c0_142] : memref<1x64x32xbf16, #tpu.memory_space<vmem>>, vector<1x64x32xbf16>
    %218 = vector.shape_cast %217 : vector<1x64x32xbf16> to vector<64x32xbf16>
    %cst_143 = arith.constant dense<0.000000e+00> : vector<8x32xf32>
    %219 = tpu.matmul %216, %218, %cst_143 {dimension_numbers = #tpu.dot_dimension_numbers<[1], [0], [0], [1], [0, 0, 1, 1], [], []>} : vector<8x64xbf16>, vector<64x32xbf16>, vector<8x32xf32> -> vector<8x32xf32>
    %c0_144 = arith.constant 0 : index
    %c0_145 = arith.constant 0 : index
    %c0_146 = arith.constant 0 : index
    %220 = vector.load %arg18[%c0_144, %c0_145, %c0_146] : memref<1x1x32xf32, #tpu.memory_space<vmem>>, vector<1x1x32xf32>
    %221 = vector.shape_cast %220 : vector<1x1x32xf32> to vector<1x32xf32>
    %222 = vector.broadcast %221 : vector<1x32xf32> to vector<8x32xf32>
    %223 = arith.addf %219, %222 : vector<8x32xf32>
    %224 = arith.addf %199, %223 : vector<8x32xf32>
    %c0_147 = arith.constant 0 : index
    %c0_148 = arith.constant 0 : index
    %225 = vector.load %arg27[%c0_147, %c0_148] : memref<8x32xf32, #tpu.memory_space<vmem>>, vector<8x32xf32>
    tpu.vector_store %arg27[%c0_147, %c0_148], %224 {strides = array<i32>} : memref<8x32xf32, #tpu.memory_space<vmem>>, vector<8x32xf32>,
    %c1_i32 = arith.constant 1 : i32
    %226 = arith.cmpi eq, %arg1, %c1_i32 : i32
    %227 = arith.extui %226 : i1 to i32
    %c0_i32_149 = arith.constant 0 : i32
    %228 = arith.cmpi ne, %227, %c0_i32_149 : i32
    scf.if %228 {
      %cst_150 = arith.constant dense<0.000000e+00> : vector<8xf32>
      %229 = vector.multi_reduction <add>, %224, %cst_150 [1] : vector<8x32xf32> to vector<8xf32>
      %230 = vector.shape_cast %229 : vector<8xf32> to vector<8x1xf32>
      %cst_151 = arith.constant 3.200000e+01 : f32
      %231 = vector.broadcast %cst_151 : f32 to vector<8x1xf32>
      %232 = arith.divf %230, %231 : vector<8x1xf32>
      %233 = vector.broadcast %232 : vector<8x1xf32> to vector<8x32xf32>
      %234 = arith.subf %224, %233 : vector<8x32xf32>
      %235 = arith.mulf %234, %234 : vector<8x32xf32>
      %cst_152 = arith.constant dense<0.000000e+00> : vector<8xf32>
      %236 = vector.multi_reduction <add>, %235, %cst_152 [1] : vector<8x32xf32> to vector<8xf32>
      %237 = vector.shape_cast %236 : vector<8xf32> to vector<8x1xf32>
      %cst_153 = arith.constant 3.200000e+01 : f32
      %238 = vector.broadcast %cst_153 : f32 to vector<8x1xf32>
      %239 = arith.divf %237, %238 : vector<8x1xf32>
      %240 = vector.broadcast %232 : vector<8x1xf32> to vector<8x32xf32>
      %241 = arith.subf %224, %240 : vector<8x32xf32>
      %cst_154 = arith.constant 9.99999974E-6 : f32
      %242 = vector.broadcast %cst_154 : f32 to vector<8x1xf32>
      %243 = arith.addf %239, %242 : vector<8x1xf32>
      %244 = math.rsqrt %243 : vector<8x1xf32>
      %245 = vector.broadcast %244 : vector<8x1xf32> to vector<8x32xf32>
      %246 = arith.mulf %241, %245 : vector<8x32xf32>
      %c0_155 = arith.constant 0 : index
      %c0_156 = arith.constant 0 : index
      %247 = vector.load %arg19[%c0_155, %c0_156] : memref<1x32xf32, #tpu.memory_space<vmem>>, vector<1x32xf32>
      %248 = vector.broadcast %247 : vector<1x32xf32> to vector<8x32xf32>
      %249 = arith.mulf %246, %248 : vector<8x32xf32>
      %c0_157 = arith.constant 0 : index
      %c0_158 = arith.constant 0 : index
      %250 = vector.load %arg20[%c0_157, %c0_158] : memref<1x32xf32, #tpu.memory_space<vmem>>, vector<1x32xf32>
      %251 = vector.broadcast %250 : vector<1x32xf32> to vector<8x32xf32>
      %252 = arith.addf %249, %251 : vector<8x32xf32>
      %c0_159 = arith.constant 0 : index
      %c0_160 = arith.constant 0 : index
      %253 = vector.load %arg21[%c0_159, %c0_160] : memref<1x32xf32, #tpu.memory_space<vmem>>, vector<1x32xf32>
      %254 = vector.broadcast %253 : vector<1x32xf32> to vector<8x32xf32>
      %255 = arith.mulf %252, %254 : vector<8x32xf32>
      %cst_161 = arith.constant dense<0.000000e+00> : vector<8xf32>
      %256 = vector.multi_reduction <add>, %255, %cst_161 [1] : vector<8x32xf32> to vector<8xf32>
      %257 = vector.shape_cast %256 : vector<8xf32> to vector<8x1xf32>
      %c0_162 = arith.constant 0 : index
      %c0_163 = arith.constant 0 : index
      %258 = vector.load %arg22[%c0_162, %c0_163] : memref<1x1xf32, #tpu.memory_space<vmem>>, vector<1x1xf32>
      %259 = vector.broadcast %258 : vector<1x1xf32> to vector<8x1xf32>
      %260 = arith.addf %257, %259 : vector<8x1xf32>
      %cst_164 = arith.constant dense<0xFF800000> : vector<1xf32>
      %261 = vector.multi_reduction <maximumf>, %260, %cst_164 [0] : vector<8x1xf32> to vector<1xf32>
      %262 = vector.shape_cast %261 : vector<1xf32> to vector<1x1xf32>
      %263 = vector.broadcast %262 : vector<1x1xf32> to vector<8x1xf32>
      %264 = arith.subf %260, %263 : vector<8x1xf32>
      %265 = math.exp %264 : vector<8x1xf32>
      %cst_165 = arith.constant dense<0.000000e+00> : vector<1xf32>
      %266 = vector.multi_reduction <add>, %265, %cst_165 [0] : vector<8x1xf32> to vector<1xf32>
      %267 = vector.shape_cast %266 : vector<1xf32> to vector<1x1xf32>
      %268 = tpu.reciprocal %267 {approx = true} : vector<1x1xf32> -> vector<1x1xf32>
      %269 = vector.broadcast %268 : vector<1x1xf32> to vector<8x1xf32>
      %270 = arith.mulf %265, %269 : vector<8x1xf32>
      %271 = vector.broadcast %270 : vector<8x1xf32> to vector<8x32xf32>
      %272 = arith.mulf %271, %224 : vector<8x32xf32>
      %cst_166 = arith.constant dense<0.000000e+00> : vector<32xf32>
      %273 = vector.multi_reduction <add>, %272, %cst_166 [0] : vector<8x32xf32> to vector<32xf32>
      %274 = vector.shape_cast %273 : vector<32xf32> to vector<1x32xf32>
      %275 = arith.truncf %274 : vector<1x32xf32> to vector<1x32xbf16>
      %c0_167 = arith.constant 0 : index
      %c0_168 = arith.constant 0 : index
      %276 = vector.load %arg23[%c0_167, %c0_168] : memref<32x128xbf16, #tpu.memory_space<vmem>>, vector<32x128xbf16>
      %cst_169 = arith.constant dense<0.000000e+00> : vector<1x128xf32>
      %277 = tpu.matmul %275, %276, %cst_169 {dimension_numbers = #tpu.dot_dimension_numbers<[1], [0], [0], [1], [0, 0, 1, 1], [], []>} : vector<1x32xbf16>, vector<32x128xbf16>, vector<1x128xf32> -> vector<1x128xf32>
      %c0_170 = arith.constant 0 : index
      %c0_171 = arith.constant 0 : index
      %278 = vector.load %arg24[%c0_170, %c0_171] : memref<1x128xf32, #tpu.memory_space<vmem>>, vector<1x128xf32>
      %279 = arith.addf %277, %278 : vector<1x128xf32>
      %c0_172 = arith.constant 0 : index
      %c0_173 = arith.constant 0 : index
      %c0_174 = arith.constant 0 : index
      %280 = vector.load %arg26[%c0_172, %c0_173, %c0_174] : memref<1x8x32xf32, #tpu.memory_space<vmem>>, vector<1x8x32xf32>
      %281 = vector.shape_cast %280 : vector<1x8x32xf32> to vector<8x32xf32>
      %282 = vector.shape_cast %252 : vector<8x32xf32> to vector<1x8x32xf32>
      tpu.vector_store %arg26[%c0_172, %c0_173, %c0_174], %282 {strides = array<i32>} : memref<1x8x32xf32, #tpu.memory_space<vmem>>, vector<1x8x32xf32>,
      %c0_175 = arith.constant 0 : index
      %c0_176 = arith.constant 0 : index
      %c0_177 = arith.constant 0 : index
      %283 = vector.load %arg25[%c0_175, %c0_176, %c0_177] : memref<1x1x128xf32, #tpu.memory_space<vmem>>, vector<1x1x128xf32>
      %284 = vector.shape_cast %283 : vector<1x1x128xf32> to vector<1x128xf32>
      %285 = vector.shape_cast %279 : vector<1x128xf32> to vector<1x1x128xf32>
      tpu.vector_store %arg25[%c0_175, %c0_176, %c0_177], %285 {strides = array<i32>} : memref<1x1x128xf32, #tpu.memory_space<vmem>>, vector<1x1x128xf32>,
    } else {
    }
    return
  }
  func.func @transform_0(%arg0: i32, %arg1: i32) -> (i32, i32, i32) {
    %c0_i32 = arith.constant 0 : i32
    %c0_i32_0 = arith.constant 0 : i32
    %c0_i32_1 = arith.constant 0 : i32
    return %arg0, %c0_i32, %c0_i32_0 : i32, i32, i32
  }
  func.func @transform_1(%arg0: i32, %arg1: i32) -> (i32, i32, i32) {
    %c0_i32 = arith.constant 0 : i32
    %c0_i32_0 = arith.constant 0 : i32
    %c0_i32_1 = arith.constant 0 : i32
    %c0_i32_2 = arith.constant 0 : i32
    return %c0_i32, %c0_i32_0, %c0_i32_1 : i32, i32, i32
  }
  func.func @transform_2(%arg0: i32, %arg1: i32) -> (i32, i32, i32) {
    %c0_i32 = arith.constant 0 : i32
    %c0_i32_0 = arith.constant 0 : i32
    %c0_i32_1 = arith.constant 0 : i32
    return %arg1, %c0_i32, %c0_i32_0 : i32, i32, i32
  }
  func.func @transform_3(%arg0: i32, %arg1: i32) -> (i32, i32, i32) {
    %c0_i32 = arith.constant 0 : i32
    %c0_i32_0 = arith.constant 0 : i32
    %c0_i32_1 = arith.constant 0 : i32
    return %arg1, %c0_i32, %c0_i32_0 : i32, i32, i32
  }
  func.func @transform_4(%arg0: i32, %arg1: i32) -> (i32, i32, i32) {
    %c0_i32 = arith.constant 0 : i32
    %c0_i32_0 = arith.constant 0 : i32
    %c0_i32_1 = arith.constant 0 : i32
    return %arg1, %c0_i32, %c0_i32_0 : i32, i32, i32
  }
  func.func @transform_5(%arg0: i32, %arg1: i32) -> (i32, i32, i32) {
    %c0_i32 = arith.constant 0 : i32
    %c0_i32_0 = arith.constant 0 : i32
    %c0_i32_1 = arith.constant 0 : i32
    return %arg1, %c0_i32, %c0_i32_0 : i32, i32, i32
  }
  func.func @transform_6(%arg0: i32, %arg1: i32) -> (i32, i32, i32, i32) {
    %c0_i32 = arith.constant 0 : i32
    %c0_i32_0 = arith.constant 0 : i32
    %c0_i32_1 = arith.constant 0 : i32
    %c0_i32_2 = arith.constant 0 : i32
    return %arg1, %c0_i32, %c0_i32_0, %c0_i32_1 : i32, i32, i32, i32
  }
  func.func @transform_7(%arg0: i32, %arg1: i32) -> (i32, i32, i32, i32) {
    %c0_i32 = arith.constant 0 : i32
    %c0_i32_0 = arith.constant 0 : i32
    %c0_i32_1 = arith.constant 0 : i32
    %c0_i32_2 = arith.constant 0 : i32
    return %arg1, %c0_i32, %c0_i32_0, %c0_i32_1 : i32, i32, i32, i32
  }
  func.func @transform_8(%arg0: i32, %arg1: i32) -> (i32, i32, i32, i32) {
    %c0_i32 = arith.constant 0 : i32
    %c0_i32_0 = arith.constant 0 : i32
    %c0_i32_1 = arith.constant 0 : i32
    %c0_i32_2 = arith.constant 0 : i32
    return %arg1, %c0_i32, %c0_i32_0, %c0_i32_1 : i32, i32, i32, i32
  }
  func.func @transform_9(%arg0: i32, %arg1: i32) -> (i32, i32, i32, i32) {
    %c0_i32 = arith.constant 0 : i32
    %c0_i32_0 = arith.constant 0 : i32
    %c0_i32_1 = arith.constant 0 : i32
    %c0_i32_2 = arith.constant 0 : i32
    return %arg1, %c0_i32, %c0_i32_0, %c0_i32_1 : i32, i32, i32, i32
  }
  func.func @transform_10(%arg0: i32, %arg1: i32) -> (i32, i32, i32) {
    %c0_i32 = arith.constant 0 : i32
    %c0_i32_0 = arith.constant 0 : i32
    %c0_i32_1 = arith.constant 0 : i32
    return %arg1, %c0_i32, %c0_i32_0 : i32, i32, i32
  }
  func.func @transform_11(%arg0: i32, %arg1: i32) -> (i32, i32, i32) {
    %c0_i32 = arith.constant 0 : i32
    %c0_i32_0 = arith.constant 0 : i32
    %c0_i32_1 = arith.constant 0 : i32
    return %arg1, %c0_i32, %c0_i32_0 : i32, i32, i32
  }
  func.func @transform_12(%arg0: i32, %arg1: i32) -> (i32, i32, i32) {
    %c0_i32 = arith.constant 0 : i32
    %c0_i32_0 = arith.constant 0 : i32
    %c0_i32_1 = arith.constant 0 : i32
    return %arg1, %c0_i32, %c0_i32_0 : i32, i32, i32
  }
  func.func @transform_13(%arg0: i32, %arg1: i32) -> (i32, i32, i32) {
    %c0_i32 = arith.constant 0 : i32
    %c0_i32_0 = arith.constant 0 : i32
    %c0_i32_1 = arith.constant 0 : i32
    return %arg1, %c0_i32, %c0_i32_0 : i32, i32, i32
  }
  func.func @transform_14(%arg0: i32, %arg1: i32) -> (i32, i32, i32) {
    %c0_i32 = arith.constant 0 : i32
    %c0_i32_0 = arith.constant 0 : i32
    %c0_i32_1 = arith.constant 0 : i32
    return %arg1, %c0_i32, %c0_i32_0 : i32, i32, i32
  }
  func.func @transform_15(%arg0: i32, %arg1: i32) -> (i32, i32, i32) {
    %c0_i32 = arith.constant 0 : i32
    %c0_i32_0 = arith.constant 0 : i32
    %c0_i32_1 = arith.constant 0 : i32
    return %arg1, %c0_i32, %c0_i32_0 : i32, i32, i32
  }
  func.func @transform_16(%arg0: i32, %arg1: i32) -> (i32, i32, i32) {
    %c0_i32 = arith.constant 0 : i32
    %c0_i32_0 = arith.constant 0 : i32
    %c0_i32_1 = arith.constant 0 : i32
    return %arg1, %c0_i32, %c0_i32_0 : i32, i32, i32
  }
  func.func @transform_17(%arg0: i32, %arg1: i32) -> (i32, i32) {
    %c0_i32 = arith.constant 0 : i32
    %c0_i32_0 = arith.constant 0 : i32
    %c0_i32_1 = arith.constant 0 : i32
    return %c0_i32, %c0_i32_0 : i32, i32
  }
  func.func @transform_18(%arg0: i32, %arg1: i32) -> (i32, i32) {
    %c0_i32 = arith.constant 0 : i32
    %c0_i32_0 = arith.constant 0 : i32
    %c0_i32_1 = arith.constant 0 : i32
    return %c0_i32, %c0_i32_0 : i32, i32
  }
  func.func @transform_19(%arg0: i32, %arg1: i32) -> (i32, i32) {
    %c0_i32 = arith.constant 0 : i32
    %c0_i32_0 = arith.constant 0 : i32
    %c0_i32_1 = arith.constant 0 : i32
    return %c0_i32, %c0_i32_0 : i32, i32
  }
  func.func @transform_20(%arg0: i32, %arg1: i32) -> (i32, i32) {
    %c0_i32 = arith.constant 0 : i32
    %c0_i32_0 = arith.constant 0 : i32
    %c0_i32_1 = arith.constant 0 : i32
    return %c0_i32, %c0_i32_0 : i32, i32
  }
  func.func @transform_21(%arg0: i32, %arg1: i32) -> (i32, i32) {
    %c0_i32 = arith.constant 0 : i32
    %c0_i32_0 = arith.constant 0 : i32
    %c0_i32_1 = arith.constant 0 : i32
    return %c0_i32, %c0_i32_0 : i32, i32
  }
  func.func @transform_22(%arg0: i32, %arg1: i32) -> (i32, i32) {
    %c0_i32 = arith.constant 0 : i32
    %c0_i32_0 = arith.constant 0 : i32
    %c0_i32_1 = arith.constant 0 : i32
    return %c0_i32, %c0_i32_0 : i32, i32
  }
  func.func @transform_23(%arg0: i32, %arg1: i32) -> (i32, i32, i32) {
    %c0_i32 = arith.constant 0 : i32
    %c0_i32_0 = arith.constant 0 : i32
    %c0_i32_1 = arith.constant 0 : i32
    return %arg0, %c0_i32, %c0_i32_0 : i32, i32, i32
  }
  func.func @transform_24(%arg0: i32, %arg1: i32) -> (i32, i32, i32) {
    %c0_i32 = arith.constant 0 : i32
    %c0_i32_0 = arith.constant 0 : i32
    %c0_i32_1 = arith.constant 0 : i32
    return %arg0, %c0_i32, %c0_i32_0 : i32, i32, i32
  }
}

</mosaic_0001>

<bundles_post_ra>
// kernel: tpu_custom_call.1
= control target key start
LH: loop header
LB: loop body
LE: loop exit
PB: predicated region body
PF: predicated region fallthrough
CT: control target
= control target key end

     0   :  { %s4341_s0 = inlined_call_operand.vmem [shape: f32[2,8,32], index: 0, kind: input, shape index: {}]   ;;  %s4342_s1 = inlined_call_operand.vmem [shape: f32[1,8,32], index: 1, kind: input, shape index: {}]   ;;  %s4343_s2 = inlined_call_operand.vmem [shape: f32[2,1,32], index: 2, kind: input, shape index: {}]   ;;  %s4344_s3 = inlined_call_operand.vmem [shape: f32[2,1,32], index: 3, kind: input, shape index: {}]   ;;  %s4345_s4 = inlined_call_operand.vmem [shape: f32[2,1,32], index: 4, kind: input, shape index: {}]   ;;  %s4346_s5 = inlined_call_operand.vmem [shape: f32[2,1,32], index: 5, kind: input, shape index: {}]   ;;  %s4347_s6 = inlined_call_operand.vmem [shape: bf16[2,4,32,8], index: 6, kind: input, shape index: {}]   ;;  %s4348_s7 = inlined_call_operand.vmem [shape: bf16[2,4,32,8], index: 7, kind: input, shape index: {}]   ;;  %s4349_s8 = inlined_call_operand.vmem [shape: bf16[2,4,32,8], index: 8, kind: input, shape index: {}]   ;;  %s4350_s9 = inlined_call_operand.vmem [shape: bf16[2,4,8,32], index: 9, kind: input, shape index: {}]   ;;  %s4351_s10 = inlined_call_operand.vmem [shape: f32[2,1,32], index: 10, kind: input, shape index: {}]   ;;  %s4352_s11 = inlined_call_operand.vmem [shape: f32[2,1,32], index: 11, kind: input, shape index: {}]   ;;  %s4353_s12 = inlined_call_operand.vmem [shape: f32[2,1,32], index: 12, kind: input, shape index: {}]   ;;  %s4354_s13 = inlined_call_operand.vmem [shape: bf16[2,32,64], index: 13, kind: input, shape index: {}]   ;;  %s4355_s14 = inlined_call_operand.vmem [shape: f32[2,1,64], index: 14, kind: input, shape index: {}]   ;;  %s4356_s15 = inlined_call_operand.vmem [shape: bf16[2,64,32], index: 15, kind: input, shape index: {}]   ;;  %s4357_s16 = inlined_call_operand.vmem [shape: f32[2,1,32], index: 16, kind: input, shape index: {}]   ;;  %s4358_s17 = inlined_call_operand.vmem [shape: f32[1,32], index: 17, kind: input, shape index: {}]   ;;  %s4359_s18 = inlined_call_operand.vmem [shape: f32[1,32], index: 18, kind: input, shape index: {}]   ;;  %s4360_s19 = inlined_call_operand.vmem [shape: f32[1,32], index: 19, kind: input, shape index: {}]   ;;  %s4361_s20 = inlined_call_operand.<no memory space> [shape: f32[1,1], index: 20, kind: input, shape index: {}]   ;;  %s4362_s21 = inlined_call_operand.vmem [shape: bf16[32,128], index: 21, kind: input, shape index: {}]   ;;  %s4363_s22 = inlined_call_operand.vmem [shape: f32[1,128], index: 22, kind: input, shape index: {}]   ;;  %s4364_s23 = inlined_call_operand.hbm [shape: f32[2,1,128], index: 23, kind: output, shape index: {0}]   ;;  %s4365_s24 = inlined_call_operand.hbm [shape: f32[2,8,32], index: 24, kind: output, shape index: {1}]  }
   0x1   :  { %4384 = sst [smem:[#allocation24_spill]] %s4341_s0  ;;  %v30_v0 = vstv %s4361_s20 }
   0x2   :  { %4385 = sst [smem:[#allocation25_spill]] %s4342_s1  ;;  %31 = vst [vmem:[#allocation3] sm:$0x1] %v30_v0 }
   0x3   :  { %4386 = sst [smem:[#allocation26_spill]] %s4343_s2 }
   0x4   :  { %4387 = sst [smem:[#allocation27_spill]] %s4344_s3 }
   0x5   :  { %4388 = sst [smem:[#allocation28_spill]] %s4345_s4 }
   0x6   :  { %4389 = sst [smem:[#allocation29_spill]] %s4346_s5 }
   0x7   :  { %4390 = sst [smem:[#allocation30_spill]] %s4347_s6 }
   0x8   :  { %4391 = sst [smem:[#allocation31_spill]] %s4348_s7 }
   0x9   :  { %4392 = sst [smem:[#allocation32_spill]] %s4349_s8 }
   0xa   :  { %4393 = sst [smem:[#allocation33_spill]] %s4350_s9 }
   0xb   :  { %4394 = sst [smem:[#allocation34_spill]] %s4358_s17 }
   0xc   :  { %4395 = sst [smem:[#allocation35_spill]] %s4359_s18 }
   0xd   :  { %4396 = sst [smem:[#allocation36_spill]] %s4360_s19 }
   0xe   :  { %4397 = sst [smem:[#allocation37_spill]] %s4362_s21 }
   0xf   :  { %4398 = sst [smem:[#allocation38_spill]] %s4363_s22 }
  0x10   :  { %4399 = sst [smem:[#allocation39_spill]] %s4364_s23 }
  0x11   :  { %4400 = sst [smem:[#allocation40_spill]] %s4365_s24 }
  0x12   :  { %32 = vsyncpa [#allocation5], 0 }
  0x13   :  { %34 = vsyncpa [#allocation5 + $0x1], 0 }
  0x14   :  { %35 = vsyncpa [#allocation7], 0 }
  0x15   :  { %37 = vsyncpa [#allocation7 + $0x1], 0  ;;  %s3823_s27 = smov 0   ;;  %s3825_s28 = smov 0  }
  0x16   :  { %s3827_s6 = smov 0   ;;  %s3829_s2 = smov 0  }
  0x17   :  { %s3831_s29 = smov 0   ;;  %s3833_s0 = smov 0  }
  0x18   :  { %s3835_s7 = smov 0   ;;  %s3837_s20 = smov 0  }
  0x19 LB: > { %4401 = sst [smem:[#allocation10_spill]] %s3658_s27  ;;  %s3007_s30 = sadd.s32 4294967295, %s3686_s20   ;;  %s3686_s20 = sphi %s3837_s20, %s43_s20   ;;  %s3682_s7 = sphi %s3835_s7, %s4464_s7   ;;  %s3678_s0 = sphi %s3833_s0, %s4463_s0   ;;  %s3674_s29 = sphi %s3831_s29, %s4462_s29   ;;  %s3670_s2 = sphi %s3829_s2, %s4461_s2   ;;  %s3666_s6 = sphi %s3827_s6, %s4460_s6   ;;  %s3662_s28 = sphi %s3825_s28, %s4459_s28   ;;  %s3658_s27 = sphi %s3823_s27, %s4458_s27  }
  0x1a   : > { %4402 = sst [smem:[#allocation11_spill]] %s3662_s28  ;;  %s3008_s3 = sadd.s32 4294967294, %s3686_s20  }
  0x1b   : > { %4403 = sst [smem:[#allocation12_spill]] %s3666_s6  ;;  %s52_s25 = sadd.s32 1, %s3678_s0 }
  0x1c   : > { %4404 = sst [smem:[#allocation13_spill]] %s3670_s2  ;;  %p53_p0 = scmp.ge.s32.totalorder %s52_s25, 2 }
  0x1d   : > { %4405 = sst [smem:[#allocation14_spill]] %s3674_s29  ;;  %s55_s8 = sadd.s32 1, %s3682_s7 }
  0x1e   : > { %4406 = sst [smem:[#allocation15_spill]] %s3678_s0  ;;  %p635_p1 = scmp.ne.s32.totalorder %s3666_s6, %s3662_s28 }
  0x1f   : > { %4407 = sst [smem:[#allocation16_spill]] %s3682_s7  ;;  %p636_p2 = scmp.eq.s32.totalorder %s3007_s30, 3 }
  0x20   : > { %4408 = sst [smem:[#allocation17_spill]] %s3686_s20  ;;  %s4466_s25 = smov (%p53_p0, %s52_s25), 0 }
  0x21   : > { %4409 = sst [smem:[#allocation18_spill]] %s4466_s25  ;;  %s4468_s8 = smov (!%p53_p0, %s55_s8), %s3682_s7 }
  0x22   : > { %p3872_p3 = por %p636_p2, %p635_p1  ;;  %p641_p4 = scmp.ne.s32.totalorder %s3662_s28, %s3658_s27 }
  0x23   : > { %p57_p5 = scmp.ge.s32.totalorder %s4468_s8, 2  ;;  %p642_p6 = scmp.eq.s32.totalorder %s3008_s3, 3 }
  0x24   : > { %s4410_s4 = scalar_select %p3872_p3, 1, 0 }
  0x25   : > { %p3011_p7 = scmp.ge.s32.totalorder %s3686_s20, 1  ;;  %p816_p8 = scmp.lt.s32.totalorder %s3686_s20, 5 }
  0x26   : > { %4411 = sst [smem:[#allocation19_spill]] %s4410_s4  ;;  %s4470_s8 = smov (%p57_p5, %s4468_s8), 0 }
  0x27   : > { %4412 = sst [smem:[#allocation20_spill]] %s4470_s8  ;;  %p3882_p9 = por %p642_p6, %p641_p4 }
  0x28   : > { %p817_p10 = pnand %p3011_p7, %p816_p8  ;;  %s622_s5 = ssub.s32 %s3682_s7, %s4470_s8 }
  0x29   : > { %s4413_s1 = scalar_select %p3882_p9, 1, 0 }
  0x2a   : > { %s625_s26 = sadd.s32 1, %s3666_s6  ;;  %p623_p11 = scmp.eq.s32.totalorder %s622_s5, 0 }
  0x2b   : > { %4414 = sst [smem:[#allocation21_spill]] %s4413_s1  ;;  %820 = sbr.rel (%p817_p10) target bundleno = 5976 (0x1758), region = 112 }
  0x2c   : > { %s3890_s30 = scalar_select %p623_p11, %s3666_s6, %s625_s26  }
  0x2e   : > { %4415 = sst [smem:[#allocation22_spill]] %s3890_s30 }
  0x32   : > { %s3893_s3 = sand.u32 1, %s3662_s28   ;;  %p942_p12 = scmp.lt.s32.totalorder %s3674_s29, 1 }
  0x33   : > { %s3012_s25 = sshll.u32 %s3893_s3, 3  ;;  %p946_p13 = scmp.lt.s32.totalorder %s3670_s2, 1 }
  0x34   : > { %s943_s0 = scalar_select %p942_p12, %s3674_s29, 1 }
  0x35   : > { %s3900_s1 = scalar_select %p946_p13, %s3670_s2, 1 }
  0x36   : > { %s3013_s5 = sshll.u32 %s943_s0, 3  ;;  %s4416_s7 = sld [smem:[#allocation24_spill]] }
  0x37   : > { %s4421_s28 = sld [smem:[#allocation30_spill]]  ;;  %s4422_s23 = sld [smem:[#allocation31_spill]] }
  0x38   : > { %s4423_s21 = sld [smem:[#allocation32_spill]]  ;;  %s3147_s22 = sshll.u32 %s3900_s1, 4 }
  0x39   : > { %s4424_s9 = sld [smem:[#allocation33_spill]] }
  0x3c   : > { %s945_s30 = scalar_lea.vmem %s4416_s7, %s3013_s5  ;;  %s3144_s7 = sshll.u32 %s3900_s1, 6 }
  0x3d   : > { %s3925_s6 = scalar_lea.vmem %s4421_s28, %s3144_s7  ;;  %s3930_s24 = scalar_lea.vmem %s4422_s23, %s3144_s7 }
  0x3e   : > { %s3935_s19 = scalar_lea.vmem %s4423_s21, %s3144_s7  ;;  %s3958_s21 = scalar_lea.vmem %s4354_s13, %s3147_s22 }
  0x3f   : > { %s3941_s2 = scalar_lea.vmem %s4424_s9, %s3147_s22  ;;  %s3975_s23 = scalar_lea.vmem [#allocation6], %s3012_s25 }
  0x40   : > { %4425 = sst [smem:[#allocation23_spill]] %s3941_s2  ;;  %s3149_s2 = sshll.u32 %s3900_s1, 5 }
  0x41   : > { %s3972_s20 = scalar_lea.vmem %s4356_s15, %s3149_s2  ;;  %s4426_s7 = sld [smem:[#allocation13_spill]] }
  0x47   : > { %p3026_p0 = scmp.ne.s32.totalorder %s4426_s7, 0 }
  0x48   : > { %v1008_v1 = vld [vmem:[%s945_s30] sm:$0xff] (!%p3026_p0)  ;;  %s4427_s17 = sld [smem:[#allocation25_spill]] (!%p3026_p0)  ;;  %vm1011_vm0 = vcmask (!%p3026_p0), 261120  }
  0x49   : > { %1007 = sbr.rel (%p3026_p0) target bundleno = 82 (0x52), region = 116 }
  0x4e   : > { %v1009_v2 = vld [vmem:[%s4427_s17] sm:$0xff] (!%p3026_p0) }
  0x4f   : > { %v1010_v3 = vadd.f32 (!%p3026_p0), %v1009_v2, %v1008_v1 }
  0x51   : > { %1012 = vst.msk [vmem:[#allocation2] sm:$0xff] %vm1011_vm0, %v1010_v3 }
  0x52 PF: > { %vm1014_vm1 = vcmask 261120   ;;  %v3498_v11 = vld [vmem:[%s3925_s6] sm:$0xff]   ;;  %v3688_v13 = vmov 0.0   ;;  %v3500_v14 = vld [vmem:[%s3925_s6 + $0x8] sm:$0xff]   ;;  %vm3689_vm2 = vmmov 0   ;;  %s4428_s2 = sld [smem:[#allocation26_spill]]  ;;  %s4438_s27 = scalar_lea.vmem %s4352_s11, %s3900_s1 }
  0x53   : > { %v3499_v12 = vld [vmem:[%s3930_s24] sm:$0xff]   ;;  %3221 = vmatprep.subr.bf16.mxu0 %v3688_v13  ;;  %3229 = vmatprep.subr.bf16.mxu1 %v3688_v13  ;;  %v3501_v15 = vld [vmem:[%s3930_s24 + $0x8] sm:$0xff]   ;;  %s4430_s18 = sld [smem:[#allocation28_spill]]  ;;  %s4432_s4 = sld [smem:[#allocation27_spill]]  ;;  %vm1239_vm3 = vcmask 64512   ;;  %vm1303_vm4 = vcmask 1043456  }
  0x54   : > { %3222 = vmatpush3.bf16.msra.mxu0 %v3498_v11  ;;  %3230 = vmatpush3.bf16.msra.mxu1 %v3499_v12  ;;  %s4434_s9 = sld [smem:[#allocation29_spill]]  ;;  %v3502_v29 = vld [vmem:[%s3935_s19] sm:$0xff]   ;;  %v3503_v32 = vld [vmem:[%s3935_s19 + $0x8] sm:$0xff]   ;;  %v3504_v44 = vld [vmem:[%s3925_s6 + $0x10] sm:$0xff]   ;;  %s4440_s8 = scalar_lea.vmem %s4355_s14, %s3900_s1  ;;  %vm2531_vm5 = vcmask 523264  }
  0x55   : > { %3223 = vmatprep.subr.bf16.mxu0 %v3688_v13  ;;  %3231 = vmatprep.subr.bf16.mxu1 %v3688_v13  ;;  %v3505_v51 = vld [vmem:[%s3925_s6 + $0x18] sm:$0xff]   ;;  %v3506_v52 = vld [vmem:[%s3935_s19 + $0x10] sm:$0xff]  }
  0x56   : > { %3225 = vmatprep.mubr.msk.bf16.mxu0 %vm3689_vm2, %v3688_v13  ;;  %3233 = vmatprep.mubr.msk.bf16.mxu1 %vm3689_vm2, %v3688_v13  ;;  %v3507_v53 = vld [vmem:[%s3935_s19 + $0x18] sm:$0xff]  }
  0x58   : > { %v3981_v4 = vld [vmem:[#allocation2] sm:$0xff]  ;;  %3224 = vmatpush3.bf16.msra.mxu0 %v3500_v14  ;;  %3232 = vmatpush3.bf16.msra.mxu1 %v3501_v15  ;;  %s4429_s0 = scalar_lea.vmem %s4428_s2, %s3900_s1  ;;  %s4439_s2 = scalar_lea.vmem %s4353_s12, %s3900_s1 }
  0x59   : > { %v1015_v5 = vsel %vm1014_vm1, %v3981_v4, 0.0  ;;  %3237 = vmatprep.subr.bf16.mxu0 %v3688_v13  ;;  %3245 = vmatprep.subr.bf16.mxu1 %v3688_v13  ;;  %v3027_v20 = vld [vmem:[%s4429_s0] ss:$0 sm:$0xff]  ;;  %s4431_s28 = scalar_lea.vmem %s4430_s18, %s3900_s1  ;;  %s4433_s17 = scalar_lea.vmem %s4432_s4, %s3900_s1 }
  0x5a   : > { %1016 = vadd.xlane.f32.xlu0 %v1015_v5  ;;  %v3029_v21 = vld [vmem:[%s4431_s28] ss:$0 sm:$0xff]  ;;  %s4435_s29 = scalar_lea.vmem %s4434_s9, %s3900_s1  ;;  %s4436_s9 = sld [smem:[#allocation23_spill]] }
  0x5b   : > { %v3028_v23 = vld [vmem:[%s4433_s17] ss:$0 sm:$0xff]  ;;  %s4441_s18 = scalar_lea.vmem %s4357_s16, %s3900_s1  ;;  %s4442_s28 = sld [smem:[#allocation13_spill]] }
  0x5c   : > { %v3030_v24 = vld [vmem:[%s4435_s29] ss:$0 sm:$0xff] }
  0x61   : > { %p3131_p1 = scmp.ne.s32.totalorder %s4442_s28, 1 }
  0x62   : > { %s4443_s22 = sld [smem:[#allocation34_spill]] (!%p3131_p1)  ;;  %vm2629_vm6 = vcmask (!%p3131_p1), 7168   ;;  %vm3692_vm7 = vmmov (!%p3131_p1), 0  }
  0xe7   : > { %v1017_v6 = vpop.xlane.xlu0 %1016 }
  0xe8   : > { %v1019_v7 = vmul.f32 0.03125, %v1017_v6 }
  0xea   : > { %v1020_v8 = vsub.f32 %v3981_v4, %v1019_v7 }
  0xec   : > { %v1021_v9 = vmul.f32 %v1020_v8, %v1020_v8 }
  0xee   : > { %v1022_v10 = vsel %vm1014_vm1, %v1021_v9, 0.0 }
  0xef   : > { %1023 = vadd.xlane.f32.xlu0 %v1022_v10 }
 0x17c   : > { %v1024_v16 = vpop.xlane.xlu0 %1023 }
 0x17d   : > { %v1025_v17 = vmul.f32 0.03125, %v1024_v16  ;;  %v3508_v16 = vld [vmem:[%s3930_s24 + $0x10] sm:$0xff]  }
 0x17f   : > { %v1026_v18 = vadd.f32 1e-05, %v1025_v17 }
 0x181   : > { %3528 = vrsqrt.f32 %v1026_v18  ;;  %v3509_v18 = vld [vmem:[%s3930_s24 + $0x18] sm:$0xff]  }
 0x18b   : > { %v3529_v19 = vpop.eup %3528 }
 0x18c   : > { %v1028_v22 = vmul.f32 %v3529_v19, %v1020_v8 }
 0x18e   : > { %v1036_v25 = vmul.f32 %v3027_v20, %v1028_v22  ;;  %v1053_v26 = vmul.f32 %v3029_v21, %v1028_v22 }
 0x190   : > { %v1044_v27 = vadd.f32 %v3028_v23, %v1036_v25  ;;  %v1061_v28 = vadd.f32 %v3030_v24, %v1053_v26 }
 0x192   : > { %v4022_v30 = vpack.c.bf16 %v1044_v27, %v1044_v27  ;;  %v4024_v31 = vpack.c.bf16 %v1061_v28, %v1061_v28 }
 0x194   : > { %3226 = vmatmul.mubr.msk.bf16.vlgmr.msra.gmra.mrb[0].mxu0 %vm1014_vm1, %v4022_v30  ;;  %3234 = vmatmul.mubr.msk.bf16.vlgmr.msra.gmra.mrb[0].mxu1 %vm1014_vm1, %v4024_v31 }
 0x195   : > { %3238 = vmatpush3.bf16.msra.mxu0 %v3502_v29  ;;  %3241 = vmatprep.mubr.msk.bf16.mxu0 %vm3689_vm2, %v3688_v13 }
 0x196   : > { %3239 = vmatprep.subr.bf16.mxu0 %v3688_v13  ;;  %3247 = vmatprep.mubr.msk.bf16.mxu1 %vm3689_vm2, %v3688_v13 }
 0x199   : > { %3240 = vmatpush3.bf16.msra.mxu0 %v3503_v32 }
 0x19a   : > { %3251 = vmatprep.subr.bf16.mxu0 %v3688_v13 }
 0x19c   : > { %3242 = vmatmul.mubr.msk.bf16.vlgmr.msra.gmra.mrb[4].mxu0 %vm1014_vm1, %v4024_v31 }
 0x19d   : > { %3253 = vmatprep.mubr.msk.bf16.mxu0 %vm3689_vm2, %v3688_v13 }
 0x267   : > { %v1116_v33 = vpop.f32.mrb[0].mxu0  ;;  %v1175_v34 = vpop.f32.mrb[0].mxu1 }
 0x268   : > { %v1238_v35 = vpack.c.bf16 %v1175_v34, %v1175_v34  ;;  %v3227_v36 = vpop.f32.mrb[1].mxu0  ;;  %v3235_v37 = vpop.f32.mrb[1].mxu1  ;;  %v1237_v45 = vpack.c.bf16 %v1116_v33, %v1116_v33 }
 0x269   : > { %v1119_v38 = vpop.f32.mrb[2].mxu0  ;;  %v1178_v39 = vpop.f32.mrb[2].mxu1 }
 0x26a   : > { %v1244_v40 = vsel %vm1239_vm3, %v1238_v35, 0  ;;  %v3228_v41 = vpop.f32.mrb[3].mxu0  ;;  %v3236_v42 = vpop.f32.mrb[3].mxu1 }
 0x26b   : > { %3246 = vmatpush3.bf16.xpose.msra.mxu1 %v1244_v40 }
 0x26c   : > { %3257 = vmatprep.subr.bf16.mxu1 %v3688_v13 }
 0x26f   : > { %v1231_v43 = vpop.f32.mrb[4].mxu0 }
 0x270   : > { %v1299_v46 = vpack.c.bf16 %v1231_v43, %v1231_v43  ;;  %v3243_v47 = vpop.f32.mrb[5].mxu0  ;;  %v3065_v43 = vld [vmem:[%s4436_s9 + $0x4] sm:$0xf] }
 0x271   : > { %v1234_v48 = vpop.f32.mrb[6].mxu0  ;;  %v1348_v47 = vld [vmem:[%s4436_s9] sm:$0xf] }
 0x272   : > { %v1305_v49 = vsel %vm1303_vm4, %v1299_v46, 0  ;;  %v3244_v50 = vpop.f32.mrb[7].mxu0  ;;  %3248 = vmatmul.mubr.msk.bf16.vlgmr.msra.gmra.mrb[4].mxu1 %vm1239_vm3, %v1237_v45 }
 0x273   : > { %3252 = vmatpush3.bf16.msra.mxu0 %v1305_v49  ;;  %3258 = vmatpush3.bf16.msra.mxu1 %v3504_v44  ;;  %v1635_v44 = vsel %vm1303_vm4, %v3065_v43, 0  ;;  %v1681_v50 = vsel %vm1303_vm4, %v1348_v47, 0  ;;  %v3517_v47 = vld [vmem:[%s3925_s6 + $0x38] sm:$0xff]  }
 0x274   : > { %3259 = vmatprep.subr.bf16.mxu1 %v3688_v13  ;;  %3261 = vmatprep.mubr.msk.bf16.mxu1 %vm3689_vm2, %v3688_v13 }
 0x275   : > { %3265 = vmatprep.subr.bf16.mxu0 %v3688_v13 }
 0x277   : > { %3260 = vmatpush3.bf16.msra.mxu1 %v3505_v51  ;;  %v3510_v51 = vld [vmem:[%s3930_s24 + $0x20] sm:$0xff]  }
 0x278   : > { %3273 = vmatprep.subr.bf16.mxu1 %v3688_v13 }
 0x27a   : > { %3262 = vmatmul.mubr.msk.bf16.vlgmr.msra.gmra.mrb[8].mxu1 %vm1014_vm1, %v4022_v30 }
 0x27b   : > { %3274 = vmatpush3.bf16.msra.mxu1 %v3506_v52  ;;  %3277 = vmatprep.mubr.msk.bf16.mxu1 %vm3689_vm2, %v3688_v13 }
 0x27c   : > { %3275 = vmatprep.subr.bf16.mxu1 %v3688_v13 }
 0x27f   : > { %3276 = vmatpush3.bf16.msra.mxu1 %v3507_v53  ;;  %v3511_v53 = vld [vmem:[%s3930_s24 + $0x28] sm:$0xff]  }
 0x280   : > { %3287 = vmatprep.subr.bf16.mxu1 %v3688_v13 }
 0x282   : > { %3278 = vmatmul.mubr.msk.bf16.vlgmr.msra.gmra.mrb[12].mxu1 %vm1014_vm1, %v4024_v31 }
 0x283   : > { %3289 = vmatprep.mubr.msk.bf16.mxu1 %vm3689_vm2, %v3688_v13 }
 0x345   : > { %v1280_v54 = vpop.f32.mrb[4].mxu1 }
 0x346   : > { %v1286_v55 = vmul.f32 0.35355338, %v1280_v54  ;;  %v3249_v56 = vpop.f32.mrb[5].mxu1 }
 0x347   : > { %v1283_v57 = vpop.f32.mrb[6].mxu1 }
 0x348   : > { %v3250_v58 = vpop.f32.mrb[7].mxu1  ;;  %v1287_v59 = vsel %vm1239_vm3, %v1286_v55, -inf }
 0x349   : > { %1288 = vmax.xlane.f32.xlu1 %v1287_v59 }
 0x34d   : > { %v1400_v60 = vpop.f32.mrb[8].mxu1 }
 0x34e   : > { %v3263_v61 = vpop.f32.mrb[9].mxu1  ;;  %v1520_v29 = vpack.c.bf16 %v1400_v60, %v1400_v60  ;;  %v3513_v60 = vld [vmem:[%s3925_s6 + $0x28] sm:$0xff]  }
 0x34f   : > { %v1403_v62 = vpop.f32.mrb[10].mxu1 }
 0x350   : > { %v3264_v63 = vpop.f32.mrb[11].mxu1  ;;  %v3514_v62 = vld [vmem:[%s3935_s19 + $0x20] sm:$0xff]  }
 0x355   : > { %v1514_v0 = vpop.f32.mrb[12].mxu1 }
 0x356   : > { %v1581_v1 = vpack.c.bf16 %v1514_v0, %v1514_v0  ;;  %v3279_v2 = vpop.f32.mrb[13].mxu1 }
 0x357   : > { %v1517_v3 = vpop.f32.mrb[14].mxu1  ;;  %v3515_v2 = vld [vmem:[%s3935_s19 + $0x28] sm:$0xff]  }
 0x358   : > { %v1586_v5 = vsel %vm1303_vm4, %v1581_v1, 0  ;;  %v3280_v6 = vpop.f32.mrb[15].mxu1 }
 0x359   : > { %3288 = vmatpush3.bf16.msra.mxu1 %v1586_v5 }
 0x35a   : > { %3299 = vmatprep.subr.bf16.mxu1 %v3688_v13 }
 0x3d6   : > { %v1289_v7 = vpop.xlane.xlu1 %1288 }
 0x3d7   : > { %v1290_v8 = vsub.f32 %v1286_v55, %v1289_v7  ;;  %v3512_v55 = vld [vmem:[%s3925_s6 + $0x20] sm:$0xff]  }
 0x3d9   : > { %v1291_v9 = vmul.f32 1.442695, %v1290_v8 }
 0x3db   : > { %3530 = vpow2.f32 %v1291_v9 }
 0x3e5   : > { %v3531_v10 = vpop.eup %3530 }
 0x3e6   : > { %v1293_v11 = vsel %vm1239_vm3, %v3531_v10, 0.0 }
 0x3e7   : > { %1294 = vadd.xlane.f32.xlu1 %v1293_v11 }
 0x474   : > { %v1295_v12 = vpop.xlane.xlu1 %1294 }
 0x475   : > { %3532 = vrcp.f32 %v1295_v12 }
 0x47f   : > { %v3533_v14 = vpop.eup %3532 }
 0x480   : > { %v1297_v15 = vmul.f32 %v3533_v14, %v3531_v10 }
 0x482   : > { %v1298_v17 = vpack.c.bf16 %v1297_v15, %v1297_v15 }
 0x484   : > { %3254 = vmatmul.mubr.msk.bf16.vlgmr.msra.gmra.mrb[8].mxu0 %vm1239_vm3, %v1298_v17 }
 0x485   : > { %3266 = vmatpush3.bf16.msra.mxu0 %v3508_v16  ;;  %3269 = vmatprep.mubr.msk.bf16.mxu0 %vm3689_vm2, %v3688_v13 }
 0x486   : > { %3267 = vmatprep.subr.bf16.mxu0 %v3688_v13 }
 0x489   : > { %3268 = vmatpush3.bf16.msra.mxu0 %v3509_v18 }
 0x48a   : > { %3281 = vmatprep.subr.bf16.mxu0 %v3688_v13 }
 0x48c   : > { %3270 = vmatmul.mubr.msk.bf16.vlgmr.msra.gmra.mrb[12].mxu0 %vm1014_vm1, %v4024_v31 }
 0x48d   : > { %3283 = vmatprep.mubr.msk.bf16.mxu0 %vm3689_vm2, %v3688_v13 }
 0x557   : > { %v1341_v19 = vpop.f32.mrb[8].mxu0 }
 0x558   : > { %v3255_v20 = vpop.f32.mrb[9].mxu0  ;;  %v1347_v52 = vpack.c.bf16 %v1341_v19, %v1341_v19 }
 0x559   : > { %v1344_v21 = vpop.f32.mrb[10].mxu0 }
 0x55a   : > { %v3256_v22 = vpop.f32.mrb[11].mxu0 }
 0x55f   : > { %v1457_v23 = vpop.f32.mrb[12].mxu0 }
 0x560   : > { %v1521_v24 = vpack.c.bf16 %v1457_v23, %v1457_v23  ;;  %v3271_v25 = vpop.f32.mrb[13].mxu0 }
 0x561   : > { %v1460_v26 = vpop.f32.mrb[14].mxu0 }
 0x562   : > { %v1526_v27 = vsel %vm1239_vm3, %v1521_v24, 0  ;;  %v3272_v28 = vpop.f32.mrb[15].mxu0 }
 0x563   : > { %3282 = vmatpush3.bf16.xpose.msra.mxu0 %v1526_v27 }
 0x564   : > { %3293 = vmatprep.subr.bf16.mxu0 %v3688_v13 }
 0x56a   : > { %3284 = vmatmul.mubr.msk.bf16.vlgmr.msra.gmra.mrb[16].mxu0 %vm1239_vm3, %v1520_v29 }
 0x56b   : > { %3295 = vmatprep.mubr.msk.bf16.mxu0 %vm3689_vm2, %v3688_v13  ;;  %3294 = vmatpush3.bf16.msra.mxu0 %v1635_v44 }
 0x56c   : > { %3305 = vmatprep.subr.bf16.mxu0 %v3688_v13 }
 0x63d   : > { %v1562_v32 = vpop.f32.mrb[16].mxu0 }
 0x63e   : > { %v1568_v33 = vmul.f32 0.35355338, %v1562_v32  ;;  %v3285_v34 = vpop.f32.mrb[17].mxu0 }
 0x63f   : > { %v1565_v35 = vpop.f32.mrb[18].mxu0 }
 0x640   : > { %v3286_v36 = vpop.f32.mrb[19].mxu0  ;;  %v1569_v37 = vsel %vm1239_vm3, %v1568_v33, -inf }
 0x641   : > { %1570 = vmax.xlane.f32.xlu0 %v1569_v37 }
 0x6ce   : > { %v1571_v38 = vpop.xlane.xlu0 %1570 }
 0x6cf   : > { %v1572_v39 = vsub.f32 %v1568_v33, %v1571_v38 }
 0x6d1   : > { %v1573_v40 = vmul.f32 1.442695, %v1572_v39 }
 0x6d3   : > { %3534 = vpow2.f32 %v1573_v40  ;;  %v3091_v40 = vld [vmem:[%s4436_s9 + $0x8] sm:$0xf] }
 0x6dd   : > { %v3535_v41 = vpop.eup %3534 }
 0x6de   : > { %v1575_v42 = vsel %vm1239_vm3, %v3535_v41, 0.0 }
 0x6df   : > { %1576 = vadd.xlane.f32.xlu1 %v1575_v42 }
 0x76c   : > { %v1577_v45 = vpop.xlane.xlu1 %1576 }
 0x76d   : > { %3536 = vrcp.f32 %v1577_v45  ;;  %v3516_v45 = vld [vmem:[%s3925_s6 + $0x30] sm:$0xff]  }
 0x777   : > { %v3537_v46 = vpop.eup %3536 }
 0x778   : > { %v1579_v48 = vmul.f32 %v3537_v46, %v3535_v41  ;;  %v2009_v41 = vsel %vm1303_vm4, %v3091_v40, 0 }
 0x77a   : > { %v1580_v49 = vpack.c.bf16 %v1579_v48, %v1579_v48  ;;  %v3518_v48 = vld [vmem:[%s3935_s19 + $0x30] sm:$0xff]  }
 0x77c   : > { %3290 = vmatmul.mubr.msk.bf16.vlgmr.msra.gmra.mrb[16].mxu1 %vm1239_vm3, %v1580_v49  ;;  %v3519_v49 = vld [vmem:[%s3935_s19 + $0x38] sm:$0xff]   ;;  %s4437_s19 = scalar_lea.vmem %s4351_s10, %s3900_s1 }
 0x77d   : > { %3300 = vmatpush3.bf16.msra.mxu1 %v1681_v50  ;;  %3301 = vmatprep.mubr.msk.bf16.mxu1 %vm3689_vm2, %v3688_v13  ;;  %v3118_v40 = vld [vmem:[%s4437_s19] ss:$0 sm:$0xff]  ;;  %s4445_s19 = sld [smem:[#allocation36_spill]] (!%p3131_p1) }
 0x77e   : > { %3313 = vmatprep.subr.bf16.mxu1 %v3688_v13 }
 0x784   : > { %3302 = vmatmul.mubr.msk.bf16.vlgmr.msra.gmra.mrb[20].mxu1 %vm1239_vm3, %v1347_v52 }
 0x785   : > { %3314 = vmatpush3.bf16.msra.mxu1 %v3510_v51  ;;  %3317 = vmatprep.mubr.msk.bf16.mxu1 %vm3689_vm2, %v3688_v13  ;;  %v3520_v51 = vld [vmem:[%s3930_s24 + $0x30] sm:$0xff]  }
 0x786   : > { %3315 = vmatprep.subr.bf16.mxu1 %v3688_v13 }
 0x789   : > { %3316 = vmatpush3.bf16.msra.mxu1 %v3511_v53 }
 0x78a   : > { %3329 = vmatprep.subr.bf16.mxu1 %v3688_v13 }
 0x78c   : > { %3318 = vmatmul.mubr.msk.bf16.vlgmr.msra.gmra.mrb[24].mxu1 %vm1014_vm1, %v4024_v31 }
 0x78d   : > { %3331 = vmatprep.mubr.msk.bf16.mxu1 %vm3689_vm2, %v3688_v13 }
 0x84f   : > { %v1622_v54 = vpop.f32.mrb[16].mxu1 }
 0x850   : > { %v1628_v56 = vpack.c.bf16 %v1622_v54, %v1622_v54  ;;  %v3291_v57 = vpop.f32.mrb[17].mxu1 }
 0x851   : > { %v1625_v58 = vpop.f32.mrb[18].mxu1 }
 0x852   : > { %v3292_v59 = vpop.f32.mrb[19].mxu1  ;;  %3296 = vmatmul.mubr.msk.bf16.vlgmr.msra.gmra.mrb[20].mxu0 %vm1239_vm3, %v1628_v56 }
 0x853   : > { %3306 = vmatpush3.bf16.msra.mxu0 %v3512_v55  ;;  %3309 = vmatprep.mubr.msk.bf16.mxu0 %vm3689_vm2, %v3688_v13  ;;  %v3521_v55 = vld [vmem:[%s3930_s24 + $0x38] sm:$0xff]  }
 0x854   : > { %3307 = vmatprep.subr.bf16.mxu0 %v3688_v13 }
 0x857   : > { %v1717_v61 = vpop.f32.mrb[20].mxu1  ;;  %3308 = vmatpush3.bf16.msra.mxu0 %v3513_v60 }
 0x858   : > { %v3303_v63 = vpop.f32.mrb[21].mxu1  ;;  %3321 = vmatprep.subr.bf16.mxu0 %v3688_v13 }
 0x859   : > { %v1720_v0 = vpop.f32.mrb[22].mxu1 }
 0x85a   : > { %v3304_v1 = vpop.f32.mrb[23].mxu1  ;;  %3310 = vmatmul.mubr.msk.bf16.vlgmr.msra.gmra.mrb[24].mxu0 %vm1014_vm1, %v4022_v30 }
 0x85b   : > { %3322 = vmatpush3.bf16.msra.mxu0 %v3514_v62  ;;  %3325 = vmatprep.mubr.msk.bf16.mxu0 %vm3689_vm2, %v3688_v13 }
 0x85c   : > { %3323 = vmatprep.subr.bf16.mxu0 %v3688_v13 }
 0x85f   : > { %v1831_v3 = vpop.f32.mrb[24].mxu1  ;;  %3324 = vmatpush3.bf16.msra.mxu0 %v3515_v2 }
 0x860   : > { %v1895_v5 = vpack.c.bf16 %v1831_v3, %v1831_v3  ;;  %v3319_v6 = vpop.f32.mrb[25].mxu1  ;;  %3335 = vmatprep.subr.bf16.mxu0 %v3688_v13 }
 0x861   : > { %v1834_v7 = vpop.f32.mrb[26].mxu1 }
 0x862   : > { %v1900_v8 = vsel %vm1239_vm3, %v1895_v5, 0  ;;  %v3320_v9 = vpop.f32.mrb[27].mxu1  ;;  %3326 = vmatmul.mubr.msk.bf16.vlgmr.msra.gmra.mrb[28].mxu0 %vm1014_vm1, %v4024_v31 }
 0x863   : > { %3330 = vmatpush3.bf16.xpose.msra.mxu1 %v1900_v8  ;;  %3337 = vmatprep.mubr.msk.bf16.mxu0 %vm3689_vm2, %v3688_v13 }
 0x864   : > { %3341 = vmatprep.subr.bf16.mxu1 %v3688_v13 }
 0x925   : > { %v1671_v10 = vpop.f32.mrb[20].mxu0 }
 0x926   : > { %v4127_v11 = vadd.f32 %v1717_v61, %v1671_v10  ;;  %v3297_v12 = vpop.f32.mrb[21].mxu0 }
 0x927   : > { %v1674_v14 = vpop.f32.mrb[22].mxu0 }
 0x928   : > { %v3298_v15 = vpop.f32.mrb[23].mxu0 }
 0x92d   : > { %v1774_v16 = vpop.f32.mrb[24].mxu0 }
 0x92e   : > { %v1894_v17 = vpack.c.bf16 %v1774_v16, %v1774_v16  ;;  %v3311_v18 = vpop.f32.mrb[25].mxu0 }
 0x92f   : > { %v1777_v19 = vpop.f32.mrb[26].mxu0 }
 0x930   : > { %v3312_v20 = vpop.f32.mrb[27].mxu0  ;;  %3332 = vmatmul.mubr.msk.bf16.vlgmr.msra.gmra.mrb[28].mxu1 %vm1239_vm3, %v1894_v17 }
 0x931   : > { %3343 = vmatprep.mubr.msk.bf16.mxu1 %vm3689_vm2, %v3688_v13  ;;  %3342 = vmatpush3.bf16.msra.mxu1 %v2009_v41 }
 0x932   : > { %3355 = vmatprep.subr.bf16.mxu1 %v3688_v13 }
 0x935   : > { %v1888_v21 = vpop.f32.mrb[28].mxu0 }
 0x936   : > { %v1955_v22 = vpack.c.bf16 %v1888_v21, %v1888_v21  ;;  %v3327_v23 = vpop.f32.mrb[29].mxu0 }
 0x937   : > { %v1891_v24 = vpop.f32.mrb[30].mxu0 }
 0x938   : > { %v1960_v25 = vsel %vm1303_vm4, %v1955_v22, 0  ;;  %v3328_v26 = vpop.f32.mrb[31].mxu0 }
 0x939   : > { %3336 = vmatpush3.bf16.msra.mxu0 %v1960_v25  ;;  %v3116_v26 = vld [vmem:[%s4436_s9 + $0xc] sm:$0xf]  ;;  %s4444_s9 = sld [smem:[#allocation35_spill]] (!%p3131_p1) }
 0x93a   : > { %3347 = vmatprep.subr.bf16.mxu0 %v3688_v13 }
 0xa03   : > { %v1936_v27 = vpop.f32.mrb[28].mxu1 }
 0xa04   : > { %v1942_v28 = vmul.f32 0.35355338, %v1936_v27  ;;  %v3333_v29 = vpop.f32.mrb[29].mxu1  ;;  %v2338_v27 = vsel %vm1303_vm4, %v3116_v26, 0 }
 0xa05   : > { %v1939_v32 = vpop.f32.mrb[30].mxu1 }
 0xa06   : > { %v3334_v33 = vpop.f32.mrb[31].mxu1  ;;  %v1943_v34 = vsel %vm1239_vm3, %v1942_v28, -inf }
 0xa07   : > { %1944 = vmax.xlane.f32.xlu0 %v1943_v34 }
 0xa94   : > { %v1945_v35 = vpop.xlane.xlu0 %1944 }
 0xa95   : > { %v1946_v36 = vsub.f32 %v1942_v28, %v1945_v35 }
 0xa97   : > { %v1947_v37 = vmul.f32 1.442695, %v1946_v36 }
 0xa99   : > { %3538 = vpow2.f32 %v1947_v37 }
 0xaa3   : > { %v3539_v38 = vpop.eup %3538 }
 0xaa4   : > { %v1949_v39 = vsel %vm1239_vm3, %v3539_v38, 0.0 }
 0xaa5   : > { %1950 = vadd.xlane.f32.xlu1 %v1949_v39 }
 0xb32   : > { %v1951_v42 = vpop.xlane.xlu1 %1950 }
 0xb33   : > { %3540 = vrcp.f32 %v1951_v42 }
 0xb3d   : > { %v3541_v43 = vpop.eup %3540 }
 0xb3e   : > { %v1953_v44 = vmul.f32 %v3541_v43, %v3539_v38 }
 0xb40   : > { %v1954_v46 = vpack.c.bf16 %v1953_v44, %v1953_v44 }
 0xb42   : > { %3338 = vmatmul.mubr.msk.bf16.vlgmr.msra.gmra.mrb[32].mxu0 %vm1239_vm3, %v1954_v46 }
 0xb43   : > { %3348 = vmatpush3.bf16.msra.mxu0 %v3516_v45  ;;  %3351 = vmatprep.mubr.msk.bf16.mxu0 %vm3689_vm2, %v3688_v13 }
 0xb44   : > { %3349 = vmatprep.subr.bf16.mxu0 %v3688_v13 }
 0xb47   : > { %3350 = vmatpush3.bf16.msra.mxu0 %v3517_v47 }
 0xb48   : > { %3363 = vmatprep.subr.bf16.mxu0 %v3688_v13 }
 0xb4a   : > { %3352 = vmatmul.mubr.msk.bf16.vlgmr.msra.gmra.mrb[36].mxu0 %vm1014_vm1, %v4022_v30 }
 0xb4b   : > { %3364 = vmatpush3.bf16.msra.mxu0 %v3518_v48  ;;  %3367 = vmatprep.mubr.msk.bf16.mxu0 %vm3689_vm2, %v3688_v13 }
 0xb4c   : > { %3365 = vmatprep.subr.bf16.mxu0 %v3688_v13 }
 0xb4f   : > { %3366 = vmatpush3.bf16.msra.mxu0 %v3519_v49 }
 0xb50   : > { %3377 = vmatprep.subr.bf16.mxu0 %v3688_v13 }
 0xb52   : > { %3368 = vmatmul.mubr.msk.bf16.vlgmr.msra.gmra.mrb[40].mxu0 %vm1014_vm1, %v4024_v31 }
 0xb53   : > { %3379 = vmatprep.mubr.msk.bf16.mxu0 %vm3689_vm2, %v3688_v13 }
 0xc15   : > { %v1996_v50 = vpop.f32.mrb[32].mxu0 }
 0xc16   : > { %v2002_v30 = vpack.c.bf16 %v1996_v50, %v1996_v50  ;;  %v3339_v52 = vpop.f32.mrb[33].mxu0 }
 0xc17   : > { %v1999_v53 = vpop.f32.mrb[34].mxu0  ;;  %v3522_v52 = vld [vmem:[%s3958_s21] sm:$0xff]  }
 0xc18   : > { %v3340_v54 = vpop.f32.mrb[35].mxu0  ;;  %3344 = vmatmul.mubr.msk.bf16.vlgmr.msra.gmra.mrb[32].mxu1 %vm1239_vm3, %v2002_v30  ;;  %v3523_v53 = vld [vmem:[%s3958_s21 + $0x8] sm:$0xff]  }
 0xc19   : > { %3356 = vmatpush3.bf16.msra.mxu1 %v3520_v51  ;;  %3359 = vmatprep.mubr.msk.bf16.mxu1 %vm3689_vm2, %v3688_v13 }
 0xc1a   : > { %3357 = vmatprep.subr.bf16.mxu1 %v3688_v13 }
 0xc1d   : > { %v2103_v56 = vpop.f32.mrb[36].mxu0  ;;  %3358 = vmatpush3.bf16.msra.mxu1 %v3521_v55 }
 0xc1e   : > { %v3353_v57 = vpop.f32.mrb[37].mxu0  ;;  %3371 = vmatprep.subr.bf16.mxu1 %v3688_v13  ;;  %v2223_v15 = vpack.c.bf16 %v2103_v56, %v2103_v56 }
 0xc1f   : > { %v2106_v58 = vpop.f32.mrb[38].mxu0  ;;  %v3119_v57 = vld [vmem:[%s4438_s27] ss:$0 sm:$0xff]  ;;  %s4446_s27 = sld [smem:[#allocation37_spill]] (!%p3131_p1) }
 0xc20   : > { %v3354_v59 = vpop.f32.mrb[39].mxu0  ;;  %3360 = vmatmul.mubr.msk.bf16.vlgmr.msra.gmra.mrb[36].mxu1 %vm1014_vm1, %v4024_v31 }
 0xc21   : > { %3373 = vmatprep.mubr.msk.bf16.mxu1 %vm3689_vm2, %v3688_v13  ;;  %v3120_v59 = vld [vmem:[%s4439_s2] ss:$0 sm:$0xff] }
 0xc25   : > { %v2217_v60 = vpop.f32.mrb[40].mxu0  ;;  %s4447_s25 = smov (!%p3131_p1), %s4446_s27 }
 0xc26   : > { %v2284_v61 = vpack.c.bf16 %v2217_v60, %v2217_v60  ;;  %v3369_v62 = vpop.f32.mrb[41].mxu0 }
 0xc27   : > { %v2220_v63 = vpop.f32.mrb[42].mxu0 }
 0xc28   : > { %v2289_v0 = vsel %vm1303_vm4, %v2284_v61, 0  ;;  %v3370_v1 = vpop.f32.mrb[43].mxu0  ;;  %v3524_v63 = vld [vmem:[%s3972_s20] sm:$0xff]  }
 0xc29   : > { %3378 = vmatpush3.bf16.msra.mxu0 %v2289_v0  ;;  %v3525_v0 = vld [vmem:[%s3972_s20 + $0x8] sm:$0xff]   ;;  %v3526_v1 = vld [vmem:[%s3972_s20 + $0x10] sm:$0xff]  }
 0xc2a   : > { %3389 = vmatprep.subr.bf16.mxu0 %v3688_v13 }
 0xceb   : > { %v2045_v2 = vpop.f32.mrb[32].mxu1 }
 0xcec   : > { %v2051_v3 = vadd.f32 %v2045_v2, %v4127_v11  ;;  %v3345_v5 = vpop.f32.mrb[33].mxu1  ;;  %v3527_v2 = vld [vmem:[%s3972_s20 + $0x18] sm:$0xff]   ;;  %s4449_s20 = scalar_lea.vmem (!%p3131_p1), [#allocation4], %s3893_s3 }
 0xced   : > { %v2048_v6 = vpop.f32.mrb[34].mxu1 }
 0xcee   : > { %v3346_v7 = vpop.f32.mrb[35].mxu1 }
 0xcf3   : > { %v2160_v31 = vpop.f32.mrb[36].mxu1 }
 0xcf4   : > { %v2224_v8 = vpack.c.bf16 %v2160_v31, %v2160_v31  ;;  %v3361_v9 = vpop.f32.mrb[37].mxu1 }
 0xcf5   : > { %v2163_v10 = vpop.f32.mrb[38].mxu1 }
 0xcf6   : > { %v2229_v12 = vsel %vm1239_vm3, %v2224_v8, 0  ;;  %v3362_v14 = vpop.f32.mrb[39].mxu1 }
 0xcf7   : > { %3372 = vmatpush3.bf16.xpose.msra.mxu1 %v2229_v12 }
 0xcf8   : > { %3383 = vmatprep.subr.bf16.mxu1 %v3688_v13 }
 0xcfe   : > { %3374 = vmatmul.mubr.msk.bf16.vlgmr.msra.gmra.mrb[40].mxu1 %vm1239_vm3, %v2223_v15 }
 0xcff   : > { %3385 = vmatprep.mubr.msk.bf16.mxu1 %vm3689_vm2, %v3688_v13  ;;  %3384 = vmatpush3.bf16.msra.mxu1 %v2338_v27 }
 0xd00   : > { %3397 = vmatprep.subr.bf16.mxu1 %v3688_v13 }
 0xdd1   : > { %v2265_v11 = vpop.f32.mrb[40].mxu1 }
 0xdd2   : > { %v2271_v16 = vmul.f32 0.35355338, %v2265_v11  ;;  %v3375_v17 = vpop.f32.mrb[41].mxu1  ;;  %v3125_v11 = vld [vmem:[%s4441_s18] ss:$0 sm:$0xff] }
 0xdd3   : > { %v2268_v18 = vpop.f32.mrb[42].mxu1 }
 0xdd4   : > { %v3376_v19 = vpop.f32.mrb[43].mxu1  ;;  %v2272_v20 = vsel %vm1239_vm3, %v2271_v16, -inf }
 0xdd5   : > { %2273 = vmax.xlane.f32.xlu0 %v2272_v20 }
 0xe62   : > { %v2274_v21 = vpop.xlane.xlu0 %2273 }
 0xe63   : > { %v2275_v22 = vsub.f32 %v2271_v16, %v2274_v21 }
 0xe65   : > { %v2276_v23 = vmul.f32 1.442695, %v2275_v22 }
 0xe67   : > { %3542 = vpow2.f32 %v2276_v23 }
 0xe71   : > { %v3543_v24 = vpop.eup %3542 }
 0xe72   : > { %v2278_v25 = vsel %vm1239_vm3, %v3543_v24, 0.0 }
 0xe73   : > { %2279 = vadd.xlane.f32.xlu1 %v2278_v25 }
 0xf00   : > { %v2280_v28 = vpop.xlane.xlu1 %2279 }
 0xf01   : > { %3544 = vrcp.f32 %v2280_v28 }
 0xf0b   : > { %v3545_v29 = vpop.eup %3544 }
 0xf0c   : > { %v2282_v32 = vmul.f32 %v3545_v29, %v3543_v24 }
 0xf0e   : > { %v2283_v33 = vpack.c.bf16 %v2282_v32, %v2282_v32 }
 0xf10   : > { %3380 = vmatmul.mubr.msk.bf16.vlgmr.msra.gmra.mrb[44].mxu0 %vm1239_vm3, %v2283_v33 }
 0xf11   : > { %3393 = vmatprep.mubr.msk.bf16.mxu0 %vm3689_vm2, %v3688_v13  ;;  %3390 = vmatpush3.bf16.msra.mxu0 %v3522_v52 }
 0xf12   : > { %3391 = vmatprep.subr.bf16.mxu0 %v3688_v13 }
 0xf15   : > { %3392 = vmatpush3.bf16.msra.mxu0 %v3523_v53 }
 0xfe3   : > { %v2325_v34 = vpop.f32.mrb[44].mxu0 }
 0xfe4   : > { %v2331_v35 = vpack.c.bf16 %v2325_v34, %v2325_v34  ;;  %v3381_v36 = vpop.f32.mrb[45].mxu0  ;;  %v3132_v34 = vld [vmem:[%s4443_s22] ss:$0 sm:$0xff] (!%p3131_p1) }
 0xfe5   : > { %v2328_v37 = vpop.f32.mrb[46].mxu0  ;;  %v3133_v36 = vld [vmem:[%s4444_s9] ss:$0 sm:$0xff] (!%p3131_p1) }
 0xfe6   : > { %v3382_v38 = vpop.f32.mrb[47].mxu0  ;;  %3386 = vmatmul.mubr.msk.bf16.vlgmr.msra.gmra.mrb[44].mxu1 %vm1239_vm3, %v2331_v35 }
 0xfe7   : > { %3405 = vmatprep.mubr.msk.bf16.mxu1 %vm3689_vm2, %v3688_v13  ;;  %3398 = vmatpush3.bf16.msra.mxu1 %v3524_v63  ;;  %v3134_v38 = vld [vmem:[%s4445_s19] ss:$0 sm:$0xff] (!%p3131_p1) }
 0xfe8   : > { %3399 = vmatprep.subr.bf16.mxu1 %v3688_v13  ;;  %v3552_v63 = vld [vmem:[%s4446_s27] sm:$0xff] (!%p3131_p1)  }
 0xfeb   : > { %3400 = vmatpush3.bf16.msra.mxu1 %v3525_v0  ;;  %v3691_v0 = vmov (!%p3131_p1), 0.0  }
 0xfec   : > { %3401 = vmatprep.subr.bf16.mxu1 %v3688_v13  ;;  %3409 = vmatprep.subr.bf16.mxu0 (!%p3131_p1), %v3691_v0 }
 0xfef   : > { %3402 = vmatpush3.bf16.msra.mxu1 %v3526_v1  ;;  %v3553_v1 = vld [vmem:[%s4447_s25 + $0x8] sm:$0xff] (!%p3131_p1)  }
 0xff0   : > { %3403 = vmatprep.subr.bf16.mxu1 %v3688_v13 }
 0xff3   : > { %3404 = vmatpush3.bf16.msra.mxu1 %v3527_v2 }
0x10b9   : > { %v2374_v39 = vpop.f32.mrb[44].mxu1 }
0x10ba   : > { %v2380_v41 = vadd.f32 %v2374_v39, %v2051_v3  ;;  %v3387_v42 = vpop.f32.mrb[45].mxu1  ;;  %v3121_v3 = vld [vmem:[%s4440_s8] ss:$0 sm:$0xff]  ;;  %s4448_s8 = sld [smem:[#allocation38_spill]] (!%p3131_p1) }
0x10bb   : > { %v2377_v43 = vpop.f32.mrb[46].mxu1  ;;  %v3690_v42 = vmov (!%p3131_p1), 0  }
0x10bc   : > { %v2388_v44 = vadd.f32 %v3118_v40, %v2380_v41  ;;  %v3388_v45 = vpop.f32.mrb[47].mxu1  ;;  %3550 = vset.pattern.permute.xlu1 (!%p3131_p1), %v3690_v42  ;;  %3551 = vset.pattern.permute.xlu0 (!%p3131_p1), %v3690_v42  ;;  %v3135_v43 = vld [vmem:[#allocation3] ss:$0 sm:$0xff] (!%p3131_p1) }
0x10be   : > { %v2389_v46 = vadd.f32 %v2388_v44, %v3981_v4 }
0x10c0   : > { %v2390_v47 = vsel %vm1014_vm1, %v2389_v46, 0.0 }
0x10c1   : > { %2391 = vadd.xlane.f32.xlu0 %v2390_v47 }
0x114e   : > { %v2392_v48 = vpop.xlane.xlu0 %2391 }
0x114f   : > { %v2393_v49 = vmul.f32 0.03125, %v2392_v48 }
0x1151   : > { %v2394_v50 = vsub.f32 %v2389_v46, %v2393_v49 }
0x1153   : > { %v2395_v51 = vmul.f32 %v2394_v50, %v2394_v50 }
0x1155   : > { %v2396_v30 = vsel %vm1014_vm1, %v2395_v51, 0.0 }
0x1156   : > { %2397 = vadd.xlane.f32.xlu1 %v2396_v30 }
0x11e3   : > { %v2398_v4 = vpop.xlane.xlu1 %2397 }
0x11e4   : > { %v2399_v54 = vmul.f32 0.03125, %v2398_v4 }
0x11e6   : > { %v2400_v55 = vadd.f32 1e-05, %v2399_v54 }
0x11e8   : > { %3546 = vrsqrt.f32 %v2400_v55 }
0x11f2   : > { %v3547_v56 = vpop.eup %3546 }
0x11f3   : > { %v2402_v58 = vmul.f32 %v3547_v56, %v2394_v50 }
0x11f5   : > { %v2410_v60 = vmul.f32 %v3119_v57, %v2402_v58 }
0x11f7   : > { %v2418_v61 = vadd.f32 %v3120_v59, %v2410_v60 }
0x11f9   : > { %v2419_v62 = vpack.c.bf16 %v2418_v61, %v2418_v61 }
0x11fb   : > { %3394 = vmatmul.mubr.msk.bf16.vlgmr.msra.gmra.mrb[48].mxu0 %vm1014_vm1, %v2419_v62 }
0x11fc   : > { %3410 = vmatpush3.bf16.msra.mxu0 (!%p3131_p1), %v3552_v63  ;;  %3413 = vmatprep.mubr.msk.bf16.mxu0 (!%p3131_p1), %vm3692_vm7, %v3691_v0 }
0x11fd   : > { %3411 = vmatprep.subr.bf16.mxu0 (!%p3131_p1), %v3691_v0 }
0x1200   : > { %3412 = vmatpush3.bf16.msra.mxu0 (!%p3131_p1), %v3553_v1 }
0x12ce   : > { %v2480_v5 = vpop.f32.mrb[48].mxu0 }
0x12cf   : > { %v2481_v6 = vadd.f32 %v3121_v3, %v2480_v5  ;;  %v3395_v7 = vpop.f32.mrb[49].mxu0 }
0x12d0   : > { %v2483_v31 = vpop.f32.mrb[50].mxu0 }
0x12d1   : > { %v2487_v8 = vmul.f32 0.70710677, %v2481_v6  ;;  %v3396_v9 = vpop.f32.mrb[51].mxu0  ;;  %v2486_v12 = vmul.f32 0.5, %v2481_v6 }
0x12d3   : > { %3548 = verf.f32 %v2487_v8 }
0x12dd   : > { %v3549_v10 = vpop.eup %3548 }
0x12de   : > { %v2489_v14 = vadd.f32 1.0, %v3549_v10 }
0x12e0   : > { %v2490_v15 = vmul.f32 %v2489_v14, %v2486_v12  ;;  %v2667_v14 = vld [vmem:[%s4448_s8] sm:$0x1] (!%p3131_p1) }
0x12e2   : > { %v2491_v13 = vpack.c.bf16 %v2490_v15, %v2490_v15 }
0x12e4   : > { %3406 = vmatmul.mubr.msk.bf16.vlgmr.msra.gmra.mrb[48].mxu1 %vm2531_vm5, %v2491_v13 }
0x13b6   : > { %2580 = sbr.rel (%p3131_p1) target bundleno = 5926 (0x1726), region = 120 }
0x13b7   : > { %v2569_v16 = vpop.f32.mrb[48].mxu1 }
0x13b8   : > { %v2570_v17 = vadd.f32 %v3125_v11, %v2569_v16  ;;  %v3407_v18 = vpop.f32.mrb[49].mxu1 }
0x13b9   : > { %v2572_v19 = vpop.f32.mrb[50].mxu1 }
0x13ba   : > { %v4227_v20 = vadd.f32 %v2570_v17, %v2418_v61  ;;  %v3408_v21 = vpop.f32.mrb[51].mxu1 }
0x13bc   : > { %2576 = vst.msk [vmem:[#allocation2] sm:$0xff] %vm1014_vm1, %v4227_v20  ;;  %v2581_v22 = vsel (!%p3131_p1), %vm1014_vm1, %v4227_v20, 0.0 }
0x13bd   : > { %2582 = vadd.xlane.f32.xlu0 %v2581_v22 }
0x144a   : > { %v2583_v23 = vpop.xlane.xlu0 %2582 }
0x144b   : > { %v2584_v24 = vmul.f32 0.03125, %v2583_v23 }
0x144d   : > { %v2585_v25 = vsub.f32 %v4227_v20, %v2584_v24 }
0x144f   : > { %v2586_v26 = vmul.f32 %v2585_v25, %v2585_v25 }
0x1451   : > { %v2587_v27 = vsel %vm1014_vm1, %v2586_v26, 0.0 }
0x1452   : > { %2588 = vadd.xlane.f32.xlu0 %v2587_v27 }
0x14df   : > { %v2589_v28 = vpop.xlane.xlu0 %2588 }
0x14e0   : > { %v2590_v29 = vmul.f32 0.03125, %v2589_v28 }
0x14e2   : > { %v2591_v32 = vadd.f32 1e-05, %v2590_v29 }
0x14e4   : > { %3554 = vrsqrt.f32 %v2591_v32 }
0x14ee   : > { %v3555_v33 = vpop.eup %3554 }
0x14ef   : > { %v2593_v35 = vmul.f32 %v3555_v33, %v2585_v25 }
0x14f1   : > { %v2601_v37 = vmul.f32 %v3132_v34, %v2593_v35 }
0x14f3   : > { %v2609_v39 = vadd.f32 %v3133_v36, %v2601_v37 }
0x14f5   : > { %v2617_v40 = vmul.f32 %v3134_v38, %v2609_v39  ;;  %2723 = vst.msk [vmem:[%s3975_s23] sm:$0xff] %vm1014_vm1, %v2609_v39 }
0x14f7   : > { %v2618_v41 = vsel %vm1014_vm1, %v2617_v40, 0.0 }
0x14f8   : > { %2619 = vadd.xlane.f32.xlu1 %v2618_v41 }
0x1585   : > { %v2620_v44 = vpop.xlane.xlu1 %2619 }
0x1586   : > { %v2628_v45 = vadd.f32 %v3135_v43, %v2620_v44 }
0x1588   : > { %v2630_v46 = vsel %vm2629_vm6, %v2628_v45, -inf }
0x1589   : > { %v2631_v47 = vrot.slane %v2630_v46, 4 }
0x158b   : > { %v2632_v48 = vmax.f32 %v2630_v46, %v2631_v47 }
0x158d   : > { %v2633_v49 = vrot.slane %v2632_v48, 2 }
0x158f   : > { %v2634_v50 = vmax.f32 %v2632_v48, %v2633_v49 }
0x1591   : > { %v2635_v51 = vrot.slane %v2634_v50, 1 }
0x1593   : > { %v2636_v30 = vmax.f32 %v2634_v50, %v2635_v51 }
0x1595   : > { %v2637_v52 = vsub.f32 %v2628_v45, %v2636_v30 }
0x1597   : > { %v2638_v53 = vmul.f32 1.442695, %v2637_v52 }
0x1599   : > { %3556 = vpow2.f32 %v2638_v53 }
0x15a3   : > { %v3557_v4 = vpop.eup %3556 }
0x15a4   : > { %v2640_v54 = vsel %vm2629_vm6, %v3557_v4, 0.0 }
0x15a5   : > { %v2641_v55 = vrot.slane %v2640_v54, 4 }
0x15a7   : > { %v2642_v56 = vadd.f32 %v2641_v55, %v2640_v54 }
0x15a9   : > { %v2643_v57 = vrot.slane %v2642_v56, 2 }
0x15ab   : > { %v2644_v58 = vadd.f32 %v2643_v57, %v2642_v56 }
0x15ad   : > { %v2645_v59 = vrot.slane %v2644_v58, 1 }
0x15af   : > { %v2646_v60 = vadd.f32 %v2645_v59, %v2644_v58 }
0x15b1   : > { %3558 = vrcp.f32 %v2646_v60 }
0x15bb   : > { %v3559_v61 = vpop.eup %3558 }
0x15bc   : > { %v2648_v62 = vmul.f32 %v3559_v61, %v3557_v4 }
0x15be   : > { %2651 = vperm.xlu1 %3550, %v2648_v62  }
0x163d   : > { %v2652_v2 = vpop.permute.xlu1 %2651 }
0x163e   : > { %v2654_v3 = vmul.f32 %v2652_v2, %v4227_v20 }
0x1640   : > { %v2655_v5 = vsel %vm1014_vm1, %v2654_v3, 0.0 }
0x1641   : > { %v2656_v6 = vrot.slane %v2655_v5, 4 }
0x1643   : > { %v2657_v7 = vadd.f32 %v2656_v6, %v2655_v5 }
0x1645   : > { %v2658_v31 = vrot.slane %v2657_v7, 2 }
0x1647   : > { %v2659_v8 = vadd.f32 %v2658_v31, %v2657_v7 }
0x1649   : > { %v2660_v9 = vrot.slane %v2659_v8, 1 }
0x164b   : > { %v2661_v10 = vadd.f32 %v2660_v9, %v2659_v8 }
0x164d   : > { %v2662_v12 = vpack.c.bf16 %v2661_v10, %v2661_v10 }
0x164f   : > { %3414 = vmatmul.mubr.msk.bf16.vlgmr.msra.gmra.mrb[0].mxu0 %vm1014_vm1, %v2662_v12 }
0x1722   : > { %v2717_v15 = vpop.f32.mrb[0].mxu0 }
0x1723   : > { %v2718_v13 = vadd.f32 %v2717_v15, %v2667_v14  ;;  %v3415_v11 = vpop.f32.mrb[1].mxu0 }
0x1724   : > { %v2720_v16 = vpop.f32.mrb[2].mxu0 }
0x1725   : > { %2724 = vst [vmem:[%s4449_s20] sm:$0x1] %v2718_v13  ;;  %v3416_v17 = vpop.f32.mrb[3].mxu0 }
0x1726 PF: > { %s4450_s5 = sld [smem:[#allocation14_spill]]  ;;  %s4452_s22 = sld [smem:[#allocation39_spill]] }
0x1727   : > { %s4453_s17 = scalar_lea.vmem [#allocation4], %s3893_s3  ;;  %s2726_s6 = scalar_lea.sflag [#allocation5], %s3893_s3 }
0x1728   : > { %s2743_s9 = sshll.u32 %s4453_s17, 4  ;;  %s3693_s19 = smov [#allocation4]   ;;  %s2744_s9 = int_to_ptr.vmem [resolvable:$true] %s2743_s9 }
0x1729   : > { %s3560_s24 = scalar_lea.vmem %s2744_s9, 16  ;;  %s3564_s26 = sshll.u32 %s3693_s19, 4  ;;  %s3565_s26 = int_to_ptr.vmem [resolvable:$false] %s3564_s26 }
0x172a   : > { %p3561_p2 = scmp.ne.s32.totalorder %s2744_s9, %s3560_s24  ;;  %s3566_s29 = scalar_lea.vmem %s3565_s26, 32 }
0x172b   : > { %p3567_p6 = scmp.lt.s32.totalorder %s2744_s9, %s3565_s26  ;;  %p3568_p7 = scmp.lt.s32.totalorder %s3566_s29, %s3560_s24 }
0x172c   : > { %s3140_s28 = sshll.u32 %s4450_s5, 4  ;;  %p3562_p4 = pnand %p3561_p2, %p3872_p3 }
0x172d   : > { %s4266_s4 = scalar_lea.hbm %s4452_s22, %s3140_s28  ;;  %p3569_p8 = por %p3568_p7, %p3567_p6 }
0x172e   : > { %p3563_p5 = pneg %p3562_p4 }
0x1730   : > { %p3570_p10 = pnand %p3569_p8, %p3563_p5 }
0x1732   : > { %3573 = shalt.err (!%p3570_p10)
}
0x1733   : > { %s3574_s27 = scalar_lea.hbm %s4266_s4, 16  ;;  %s3578_s21 = scalar_lea.hbm %s4452_s22, 32 }
0x1734   : > { %p3575_p11 = scmp.ne.s32.totalorder %s4266_s4, %s3574_s27  ;;  %p3579_p0 = scmp.lt.u32.totalorder %s4266_s4, %s4452_s22 }
0x1735   : > { %p3580_p1 = scmp.lt.u32.totalorder %s3578_s21, %s3574_s27  ;;  %p3582_p4 = scmp.lt.u32.totalorder %s3574_s27, %s4266_s4 }
0x1736   : > { %p3576_p12 = pnand %p3575_p11, %p3872_p3 }
0x1737   : > { %p3581_p2 = por %p3580_p1, %p3579_p0 }
0x1738   : > { %p3577_p13 = pneg %p3576_p12 }
0x1739   : > { %p3583_p5 = por %p3582_p4, %p3581_p2 }
0x173b   : > { %p3584_p6 = pnand %p3583_p5, %p3577_p13 }
0x173d   : > { %3587 = shalt.err (!%p3584_p6)
}
0x173e   : > { %3417 = dma.vmem_to_hbm [thread:$0]  (%p3872_p3), %s2744_s9, 16, %s4266_s4, %s2726_s6  }
0x173f   : > { %s3141_s20 = sshll.u32 %s4450_s5, 7  ;;  %s2756_s28 = sshll.u32 %s3975_s23, 4  ;;  %s2757_s28 = int_to_ptr.vmem [resolvable:$true] %s2756_s28 }
0x1740   : > { %s4454_s17 = sld [smem:[#allocation40_spill]]  ;;  %s2730_s19 = scalar_lea.sflag [#allocation7], %s3893_s3 }
0x1741   : > { %s3588_s26 = scalar_lea.vmem %s2757_s28, 128  ;;  %s3694_s29 = smov [#allocation6]  }
0x1742   : > { %p3589_p7 = scmp.ne.s32.totalorder %s2757_s28, %s3588_s26  ;;  %s3592_s27 = sshll.u32 %s3694_s29, 4  ;;  %s3593_s27 = int_to_ptr.vmem [resolvable:$false] %s3592_s27 }
0x1743   : > { %s3594_s30 = scalar_lea.vmem %s3593_s27, 256  ;;  %p3595_p11 = scmp.lt.s32.totalorder %s2757_s28, %s3593_s27 }
0x1744   : > { %p3590_p8 = pnand %p3589_p7, %p3872_p3  ;;  %p3596_p12 = scmp.lt.s32.totalorder %s3594_s30, %s3588_s26 }
0x1746   : > { %s4293_s24 = scalar_lea.hbm %s4454_s17, %s3141_s20  ;;  %p3591_p10 = pneg %p3590_p8 }
0x1747   : > { %p3597_p13 = por %p3596_p12, %p3595_p11 }
0x1749   : > { %p3598_p0 = pnand %p3597_p13, %p3591_p10 }
0x174b   : > { %3601 = shalt.err (!%p3598_p0)
}
0x174c   : > { %s3602_s3 = scalar_lea.hbm %s4293_s24, 128  ;;  %s3606_s4 = scalar_lea.hbm %s4454_s17, 256 }
0x174d   : > { %p3603_p1 = scmp.ne.s32.totalorder %s4293_s24, %s3602_s3  ;;  %p3607_p5 = scmp.lt.u32.totalorder %s4293_s24, %s4454_s17 }
0x174e   : > { %p3608_p6 = scmp.lt.u32.totalorder %s3606_s4, %s3602_s3  ;;  %p3610_p8 = scmp.lt.u32.totalorder %s3602_s3, %s4293_s24 }
0x174f   : > { %p3604_p2 = pnand %p3603_p1, %p3872_p3 }
0x1750   : > { %p3609_p7 = por %p3608_p6, %p3607_p5 }
0x1751   : > { %p3605_p4 = pneg %p3604_p2 }
0x1752   : > { %p3611_p10 = por %p3610_p8, %p3609_p7 }
0x1754   : > { %p3612_p11 = pnand %p3611_p10, %p3605_p4 }
0x1756   : > { %3615 = shalt.err (!%p3612_p11)
}
0x1757   : > { %3418 = dma.vmem_to_hbm [thread:$0]  (%p3872_p3), %s2757_s28, 128, %s4293_s24, %s2730_s19  }
0x1758 PF: > { %s4455_s2 = sld [smem:[#allocation17_spill]]  ;;  %s4456_s21 = sld [smem:[#allocation10_spill]] }
0x175e   : > { %p3428_p12 = scmp.ge.s32.totalorder %s4455_s2, 2  ;;  %s2768_s8 = sand.u32 1, %s4456_s21  }
0x175f   : > { %s2769_s20 = scalar_lea.sflag [#allocation5], %s2768_s8 }
0x1760   : > { %p3422_p13 = pnand %p3428_p12, %p3882_p9 }
0x1762   : > { %3649 = dma.done.wait (!%p3422_p13), %s2769_s20, 16  }
0x1763   : > { %3651 = vsyncadd (!%p3422_p13), %s2769_s20, 4294967280  ;;  %s2777_s1 = scalar_lea.sflag [#allocation7], %s2768_s8 }
0x1764   : > { %3653 = dma.done.wait (!%p3422_p13), %s2777_s1, 128  }
0x1765   : > { %3655 = vsyncadd (!%p3422_p13), %s2777_s1, 4294967168  ;;  %s43_s20 = sadd.s32 1, %s4455_s2   ;;  %s4458_s27 = sld [smem:[#allocation11_spill]] }
0x1766   : > { %p40_p0 = scmp.ge.s32.totalorder %s43_s20, 6   ;;  %s4459_s28 = sld [smem:[#allocation12_spill]] }
0x1767   : > { %s4460_s6 = sld [smem:[#allocation22_spill]]  ;;  %s4461_s2 = sld [smem:[#allocation15_spill]] }
0x1768   : > { %s4462_s29 = sld [smem:[#allocation16_spill]]  ;;  %s4463_s0 = sld [smem:[#allocation18_spill]] }
0x1769   : > { %s4464_s7 = sld [smem:[#allocation20_spill]]  ;;  %42 = sbr.rel (!%p40_p0) target bundleno = 25 (0x19), region = 229 }
0x1770   :  { %2782 = vsyncpa [#allocation5], 1 }
0x1771   :  { %2784 = vsyncpa [#allocation5 + $0x1], 1 }
0x1772   :  { %2785 = vsyncpa [#allocation7], 1 }
0x1773   :  { %2787 = vsyncpa [#allocation7 + $0x1], 1 }

</bundles_post_ra>
